<compile_context>
chip_gen: v7x
topology: tpu7x:2x2x1
jax: 0.10.0
libtpu: 0.0.40
codegen_flags: <defaults>
</compile_context>

<pallas_src>
import numpy as np

import jax
import jax.numpy as jnp
from jax.experimental import pallas as pl
from jax.experimental.pallas import tpu as pltpu


# ----------------------------------------------------------------------------
# Layouts (per pyramid level, per sample):
#   "padded": (C, Lpad) with Lpad = (H+3)*(W+2): row-flattened image with a
#             zero ring (1 top / 2 bottom rows, 1 left / 1 right cols).  The 2
#             extra bottom rows let every 3x3 tap be one contiguous flat slice
#             of length H*(W+2).
#   "wide"  : (C, H*(W+2)) conv output on the padded-width grid; columns
#             W, W+1 of each row are junk and are never read downstream.
# The batch is packed along the lane axis: (C, B*Lpad) / (C, B*win) with a
# per-sample stride of Lpad / win.
# ----------------------------------------------------------------------------
def _pad_flat(x_nchw, dtype=jnp.bfloat16):
    """(N, C, H, W) -> (C, N*(H+3)*(W+2)) zero-padded, row-flattened, bf16."""
    n, c, h, w = x_nchw.shape
    xp = jnp.pad(x_nchw, ((0, 0), (0, 0), (1, 2), (1, 1)))
    xp = xp.reshape(n, c, (h + 3) * (w + 2))
    return jnp.transpose(xp, (1, 0, 2)).reshape(c, n * (h + 3) * (w + 2)).astype(dtype)


def _ring_mask(h, w, batch):
    """(1, B*(H+3)*(W+2)) f32: 1 at real pixels, 0 on the zero-padding ring."""
    m = np.zeros((h + 3, w + 2), np.float32)
    m[1:1 + h, 1:1 + w] = 1.0
    return np.tile(m.reshape(1, -1), (1, batch))


def _upsample_selector(h_s, w_s, h_d, w_d, batch):
    """Block-diagonal nearest-neighbour selector: wide (h_s, w_s+2) -> padded
    (h_d+3, w_d+2).  Matches F.interpolate(mode='nearest')
    (src = floor(dst*in/out)); exact 0/1 matrix (stored bf16 by the caller).
    Never reads the junk columns (c >= w_s) and never writes the ring."""
    wp_s, wp_d = w_s + 2, w_d + 2
    sel = np.zeros((h_s * wp_s, (h_d + 3) * wp_d), np.float32)
    for r in range(h_d):
        sr = (r * h_s) // h_d
        for c in range(w_d):
            sc = (c * w_s) // w_d
            sel[sr * wp_s + sc, (r + 1) * wp_d + (c + 1)] = 1.0
    return np.kron(np.eye(batch, dtype=np.float32), sel)


def _crop_selector(h, w):
    """Wide (h, w+2) -> dense h*w flat output (drops junk columns); per sample."""
    wp = w + 2
    sel = np.zeros((h * wp, h * w), np.float32)
    for r in range(h):
        for c in range(w):
            sel[r * wp + c, r * w + c] = 1.0
    return sel


# ----------------------------------------------------------------------------
# The fused decoder kernel (one grid step = whole batch)
# ----------------------------------------------------------------------------
def _make_decoder_kernel(dims, batch):
    """dims: list of (H, W) per pyramid level, deepest first."""
    n_lvl = len(dims)

    def conv3x3(y, w_ref, b_ref, h, w):
        """3x3 conv (+folded BN +ReLU) as ONE K=9*C bf16 matmul over an
        in-kernel 9-tap stack.  y: padded layout (C, B*Lpad).  Returns the
        wide layout (dec, B*H*(W+2)) in f32."""
        wp = w + 2
        win = h * wp
        lpad = (h + 3) * wp
        y = y.astype(jnp.bfloat16)
        per_sample = []
        for b in range(batch):
            base = b * lpad
            taps = [y[:, base + ky * wp + kx: base + ky * wp + kx + win]
                    for ky in range(3) for kx in range(3)]
            per_sample.append(jnp.concatenate(taps, axis=0))     # (9*C, win)
        stack = (per_sample[0] if batch == 1
                 else jnp.concatenate(per_sample, axis=1))       # (9*C, B*win)
        acc = jnp.dot(w_ref[...], stack, preferred_element_type=jnp.float32)
        return jnp.maximum(acc + b_ref[...], 0.0)                # (dec, B*win)

    def kernel(*refs):
        it = iter(refs)
        feat = [next(it) for _ in range(n_lvl)]
        mid_w, mid_b = next(it), next(it)
        blocks = [dict(up=next(it), adj_w=next(it), adj_b=next(it),
                       mask=next(it), mix_w=next(it), mix_b=next(it))
                  for _ in range(n_lvl - 1)]
        crop = next(it)
        out_ref = next(it)

        # middle: 3x3 conv + folded BN + ReLU on the deepest feature
        h, w = dims[0]
        x = conv3x3(feat[0][...], mid_w, mid_b, h, w)            # wide, f32

        for i in range(1, n_lvl):
            h, w = dims[i]
            blk = blocks[i - 1]
            # nearest upsample of the previous decoder state straight into
            # this level's padded layout (exact 0/1 block-diag bf16 selector)
            x_up = jnp.dot(x.astype(jnp.bfloat16), blk["up"][...],
                           preferred_element_type=jnp.float32)   # (dec, B*Lpad)
            # 1x1 channel-adjust conv (+ folded BN) of the encoder feature;
            # the ring-masked bias keeps the zero-padding ring exactly zero
            # for the 3x3 conv below (adj and x_up are already zero there).
            adj = jnp.dot(blk["adj_w"][...], feat[i][...],
                          preferred_element_type=jnp.float32)    # (dec, B*Lpad)
            y = adj + x_up + blk["adj_b"][...] * blk["mask"][...]
            # 3x3 mix conv + folded BN + ReLU
            x = conv3x3(y, blk["mix_w"], blk["mix_b"], h, w)

        # drop the junk columns -> lane-dense (dec, H*W) per sample, f32
        h, w = dims[-1]
        win = h * (w + 2)
        for b in range(batch):
            out_ref[b] = jnp.dot(x[:, b * win:(b + 1) * win], crop[...],
                                 preferred_element_type=jnp.float32)

    return kernel


# ----------------------------------------------------------------------------
# Wrapper: host-side layout prep (pad + flatten + bf16 cast per feature,
# tiny 0/1 selector / mask constants) + one pallas_call.
# ----------------------------------------------------------------------------
def decoder_forward(params, features_nchw):
    """features_nchw: list of (N, C_i, H_i, W_i), shallow -> deep (PyTorch order).
    Returns (N, dec_channels, H_shallowest, W_shallowest), f32 NCHW."""
    feats = features_nchw[::-1]                        # deepest first
    n = int(feats[0].shape[0])
    dims = [(int(f.shape[2]), int(f.shape[3])) for f in feats]
    dec_c = int(params["middle"]["w"].shape[0])

    args, in_specs = [], []

    def add(a):                                        # grid-invariant full block
        a = jnp.asarray(a)
        args.append(a)
        in_specs.append(pl.BlockSpec(a.shape, lambda i, nd=a.ndim: (0,) * nd))

    # features: zero-padded, row-flattened, batch packed along lanes, bf16
    for f in feats:
        add(_pad_flat(f))                              # (C_i, B*Lpad_i) bf16

    add(params["middle"]["w"])                         # (dec, 9*C0)  bf16
    add(params["middle"]["b"])                         # (dec, 1)     f32

    for i in range(1, len(feats)):
        blk = params["blocks"][i - 1]
        h, w = dims[i]
        h_s, w_s = dims[i - 1]
        add(jnp.asarray(_upsample_selector(h_s, w_s, h, w, n), jnp.bfloat16))
        add(blk["adjust_w"])                           # (dec, C_i)   bf16
        add(blk["adjust_b"])                           # (dec, 1)     f32
        add(jnp.asarray(_ring_mask(h, w, n)))          # (1, B*Lpad)  f32
        add(blk["mix_w"])                              # (dec, 9*dec) bf16
        add(blk["mix_b"])                              # (dec, 1)     f32

    add(jnp.asarray(_crop_selector(*dims[-1])))        # (win_last, H*W) f32

    h_l, w_l = dims[-1]
    out = pl.pallas_call(
        _make_decoder_kernel(dims, n),
        out_shape=jax.ShapeDtypeStruct((n, dec_c, h_l * w_l), jnp.float32),
        grid=(1,),
        in_specs=in_specs,
        out_specs=pl.BlockSpec((n, dec_c, h_l * w_l), lambda i: (0, 0, 0)),
        compiler_params=pltpu.CompilerParams(dimension_semantics=("arbitrary",)),
    )(*args)
    return out.reshape(n, dec_c, h_l, w_l)


# ----------------------------------------------------------------------------
# Deterministic parameter init (eval-mode BN folded into lane-dense weights)
# ----------------------------------------------------------------------------
def _init_conv_norm(key, cin, cout, k):
    kw, kg, kb, km, kv = jax.random.split(key, 5)
    w = 0.1 * jax.random.normal(kw, (k * k, cout, cin), jnp.float32)
    gamma = 1.0 + 0.1 * jax.random.normal(kg, (cout,), jnp.float32)
    beta = 0.1 * jax.random.normal(kb, (cout,), jnp.float32)
    mean = 0.1 * jax.random.normal(km, (cout,), jnp.float32)
    var = jnp.abs(jax.random.normal(kv, (cout,), jnp.float32)) + 0.5
    scale = gamma / jnp.sqrt(var + 1e-5)               # fold BN scale into W
    bias = beta - mean * scale
    w_folded = w * scale[None, :, None]                # (k*k, cout, cin)
    # lane-dense (cout, k*k*cin); column order = tap-major, channel-minor,
    # matching the in-kernel 9-tap stack ordering.
    w_flat = jnp.transpose(w_folded, (1, 0, 2)).reshape(cout, k * k * cin)
    return w_flat.astype(jnp.bfloat16), bias.reshape(cout, 1)


def init_decoder_params(key, encoder_channels_list, decoder_channels):
    enc_rev = encoder_channels_list[::-1]
    keys = jax.random.split(key, 1 + 2 * (len(enc_rev) - 1))
    mid_w, mid_b = _init_conv_norm(keys[0], enc_rev[0], decoder_channels, 3)
    params = {"middle": {"w": mid_w, "b": mid_b}, "blocks": []}
    ki = 1
    for c in enc_rev[1:]:
        aw, ab = _init_conv_norm(keys[ki], c, decoder_channels, 1); ki += 1
        mw, mb = _init_conv_norm(keys[ki], decoder_channels, decoder_channels, 3); ki += 1
        params["blocks"].append({"adjust_w": aw,       # (dec, C_i)   bf16
                                 "adjust_b": ab,       # (dec, 1)     f32
                                 "mix_w": mw,          # (dec, 9*dec) bf16
                                 "mix_b": mb})         # (dec, 1)     f32
    return params


if __name__ == "__main__":
    key = jax.random.PRNGKey(0)
    k_params, k1, k2, k3 = jax.random.split(key, 4)

    encoder_channels_list = [4, 8, 16]        # shallow -> deep
    decoder_channels = 16
    params = init_decoder_params(k_params, encoder_channels_list, decoder_channels)

    batch = 2
    features = [
        jax.random.normal(k1, (batch, 4, 16, 16), jnp.float32),   # shallow, high-res
        jax.random.normal(k2, (batch, 8, 8, 8), jnp.float32),
        jax.random.normal(k3, (batch, 16, 4, 4), jnp.float32),    # deep, low-res
    ]

    out = decoder_forward(params, features)
    out = jax.block_until_ready(out)
    assert out.shape == (batch, decoder_channels, 16, 16), out.shape
    assert out.dtype == jnp.float32
    assert bool(jnp.all(jnp.isfinite(out)))
    print("KERNEL_OK")
</pallas_src>

<mosaic_0001>
module attributes {stable_mosaic.version = 11 : i64} {
  func.func @kernel(%arg0: i32, %arg1: memref<16x84xbf16, #tpu.memory_space<vmem>>, %arg2: memref<8x220xbf16, #tpu.memory_space<vmem>>, %arg3: memref<4x684xbf16, #tpu.memory_space<vmem>>, %arg4: memref<16x144xbf16, #tpu.memory_space<vmem>>, %arg5: memref<16x1xf32, #tpu.memory_space<vmem>>, %arg6: memref<48x220xbf16, #tpu.memory_space<vmem>>, %arg7: memref<16x8xbf16, #tpu.memory_space<vmem>>, %arg8: memref<16x1xf32, #tpu.memory_space<vmem>>, %arg9: memref<1x220xf32, #tpu.memory_space<vmem>>, %arg10: memref<16x144xbf16, #tpu.memory_space<vmem>>, %arg11: memref<16x1xf32, #tpu.memory_space<vmem>>, %arg12: memref<160x684xbf16, #tpu.memory_space<vmem>>, %arg13: memref<16x4xbf16, #tpu.memory_space<vmem>>, %arg14: memref<16x1xf32, #tpu.memory_space<vmem>>, %arg15: memref<1x684xf32, #tpu.memory_space<vmem>>, %arg16: memref<16x144xbf16, #tpu.memory_space<vmem>>, %arg17: memref<16x1xf32, #tpu.memory_space<vmem>>, %arg18: memref<288x256xf32, #tpu.memory_space<vmem>>, %arg19: memref<2x16x256xf32, #tpu.memory_space<vmem>>) attributes {dimension_semantics = [#tpu.dimension_semantics<arbitrary>], iteration_bounds = array<i64: 1>, scalar_prefetch = 0 : i64, scratch_operands = 0 : i64, tpu.core_type = #tpu.core_type<tc>, window_params = [{pipeline_mode = #tpu.pipeline_mode<synchronous>, transform_indices = @transform_0, window_bounds = array<i64: 16, 84>}, {pipeline_mode = #tpu.pipeline_mode<synchronous>, transform_indices = @transform_1, window_bounds = array<i64: 8, 220>}, {pipeline_mode = #tpu.pipeline_mode<synchronous>, transform_indices = @transform_2, window_bounds = array<i64: 4, 684>}, {pipeline_mode = #tpu.pipeline_mode<synchronous>, transform_indices = @transform_3, window_bounds = array<i64: 16, 144>}, {pipeline_mode = #tpu.pipeline_mode<synchronous>, transform_indices = @transform_4, window_bounds = array<i64: 16, 1>}, {pipeline_mode = #tpu.pipeline_mode<synchronous>, transform_indices = @transform_5, window_bounds = array<i64: 48, 220>}, {pipeline_mode = #tpu.pipeline_mode<synchronous>, transform_indices = @transform_6, window_bounds = array<i64: 16, 8>}, {pipeline_mode = #tpu.pipeline_mode<synchronous>, transform_indices = @transform_7, window_bounds = array<i64: 16, 1>}, {pipeline_mode = #tpu.pipeline_mode<synchronous>, transform_indices = @transform_8, window_bounds = array<i64: 1, 220>}, {pipeline_mode = #tpu.pipeline_mode<synchronous>, transform_indices = @transform_9, window_bounds = array<i64: 16, 144>}, {pipeline_mode = #tpu.pipeline_mode<synchronous>, transform_indices = @transform_10, window_bounds = array<i64: 16, 1>}, {pipeline_mode = #tpu.pipeline_mode<synchronous>, transform_indices = @transform_11, window_bounds = array<i64: 160, 684>}, {pipeline_mode = #tpu.pipeline_mode<synchronous>, transform_indices = @transform_12, window_bounds = array<i64: 16, 4>}, {pipeline_mode = #tpu.pipeline_mode<synchronous>, transform_indices = @transform_13, window_bounds = array<i64: 16, 1>}, {pipeline_mode = #tpu.pipeline_mode<synchronous>, transform_indices = @transform_14, window_bounds = array<i64: 1, 684>}, {pipeline_mode = #tpu.pipeline_mode<synchronous>, transform_indices = @transform_15, window_bounds = array<i64: 16, 144>}, {pipeline_mode = #tpu.pipeline_mode<synchronous>, transform_indices = @transform_16, window_bounds = array<i64: 16, 1>}, {pipeline_mode = #tpu.pipeline_mode<synchronous>, transform_indices = @transform_17, window_bounds = array<i64: 288, 256>}, {pipeline_mode = #tpu.pipeline_mode<synchronous>, transform_indices = @transform_18, window_bounds = array<i64: 2, 16, 256>}]} {
    %c0 = arith.constant 0 : index
    %c0_0 = arith.constant 0 : index
    %0 = vector.load %arg1[%c0, %c0_0] : memref<16x84xbf16, #tpu.memory_space<vmem>>, vector<16x84xbf16>
    %1 = vector.extract_strided_slice %0 {offsets = [0, 0], sizes = [16, 24], strides = [1, 1]} : vector<16x84xbf16> to vector<16x24xbf16>
    %2 = vector.extract_strided_slice %0 {offsets = [0, 1], sizes = [16, 24], strides = [1, 1]} : vector<16x84xbf16> to vector<16x24xbf16>
    %3 = vector.extract_strided_slice %0 {offsets = [0, 2], sizes = [16, 24], strides = [1, 1]} : vector<16x84xbf16> to vector<16x24xbf16>
    %4 = vector.extract_strided_slice %0 {offsets = [0, 6], sizes = [16, 24], strides = [1, 1]} : vector<16x84xbf16> to vector<16x24xbf16>
    %5 = vector.extract_strided_slice %0 {offsets = [0, 7], sizes = [16, 24], strides = [1, 1]} : vector<16x84xbf16> to vector<16x24xbf16>
    %6 = vector.extract_strided_slice %0 {offsets = [0, 8], sizes = [16, 24], strides = [1, 1]} : vector<16x84xbf16> to vector<16x24xbf16>
    %7 = vector.extract_strided_slice %0 {offsets = [0, 12], sizes = [16, 24], strides = [1, 1]} : vector<16x84xbf16> to vector<16x24xbf16>
    %8 = vector.extract_strided_slice %0 {offsets = [0, 13], sizes = [16, 24], strides = [1, 1]} : vector<16x84xbf16> to vector<16x24xbf16>
    %9 = vector.extract_strided_slice %0 {offsets = [0, 14], sizes = [16, 24], strides = [1, 1]} : vector<16x84xbf16> to vector<16x24xbf16>
    %10 = tpu.concatenate %1, %2, %3, %4, %5, %6, %7, %8, %9 in 0 : vector<16x24xbf16>, vector<16x24xbf16>, vector<16x24xbf16>, vector<16x24xbf16>, vector<16x24xbf16>, vector<16x24xbf16>, vector<16x24xbf16>, vector<16x24xbf16>, vector<16x24xbf16> -> vector<144x24xbf16>
    %11 = vector.extract_strided_slice %0 {offsets = [0, 42], sizes = [16, 24], strides = [1, 1]} : vector<16x84xbf16> to vector<16x24xbf16>
    %12 = vector.extract_strided_slice %0 {offsets = [0, 43], sizes = [16, 24], strides = [1, 1]} : vector<16x84xbf16> to vector<16x24xbf16>
    %13 = vector.extract_strided_slice %0 {offsets = [0, 44], sizes = [16, 24], strides = [1, 1]} : vector<16x84xbf16> to vector<16x24xbf16>
    %14 = vector.extract_strided_slice %0 {offsets = [0, 48], sizes = [16, 24], strides = [1, 1]} : vector<16x84xbf16> to vector<16x24xbf16>
    %15 = vector.extract_strided_slice %0 {offsets = [0, 49], sizes = [16, 24], strides = [1, 1]} : vector<16x84xbf16> to vector<16x24xbf16>
    %16 = vector.extract_strided_slice %0 {offsets = [0, 50], sizes = [16, 24], strides = [1, 1]} : vector<16x84xbf16> to vector<16x24xbf16>
    %17 = vector.extract_strided_slice %0 {offsets = [0, 54], sizes = [16, 24], strides = [1, 1]} : vector<16x84xbf16> to vector<16x24xbf16>
    %18 = vector.extract_strided_slice %0 {offsets = [0, 55], sizes = [16, 24], strides = [1, 1]} : vector<16x84xbf16> to vector<16x24xbf16>
    %19 = vector.extract_strided_slice %0 {offsets = [0, 56], sizes = [16, 24], strides = [1, 1]} : vector<16x84xbf16> to vector<16x24xbf16>
    %20 = tpu.concatenate %11, %12, %13, %14, %15, %16, %17, %18, %19 in 0 : vector<16x24xbf16>, vector<16x24xbf16>, vector<16x24xbf16>, vector<16x24xbf16>, vector<16x24xbf16>, vector<16x24xbf16>, vector<16x24xbf16>, vector<16x24xbf16>, vector<16x24xbf16> -> vector<144x24xbf16>
    %21 = tpu.concatenate %10, %20 in 1 : vector<144x24xbf16>, vector<144x24xbf16> -> vector<144x48xbf16>
    %c0_1 = arith.constant 0 : index
    %c0_2 = arith.constant 0 : index
    %22 = vector.load %arg4[%c0_1, %c0_2] : memref<16x144xbf16, #tpu.memory_space<vmem>>, vector<16x144xbf16>
    %cst = arith.constant dense<0.000000e+00> : vector<16x48xf32>
    %23 = tpu.matmul %22, %21, %cst {dimension_numbers = #tpu.dot_dimension_numbers<[1], [0], [0], [1], [0, 0, 1, 1], [], []>} : vector<16x144xbf16>, vector<144x48xbf16>, vector<16x48xf32> -> vector<16x48xf32>
    %c0_3 = arith.constant 0 : index
    %c0_4 = arith.constant 0 : index
    %24 = vector.load %arg5[%c0_3, %c0_4] : memref<16x1xf32, #tpu.memory_space<vmem>>, vector<16x1xf32>
    %25 = vector.broadcast %24 : vector<16x1xf32> to vector<16x48xf32>
    %26 = arith.addf %23, %25 : vector<16x48xf32>
    %cst_5 = arith.constant 0.000000e+00 : f32
    %27 = vector.broadcast %cst_5 : f32 to vector<16x48xf32>
    %28 = arith.maximumf %26, %27 : vector<16x48xf32>
    %29 = arith.truncf %28 : vector<16x48xf32> to vector<16x48xbf16>
    %c0_6 = arith.constant 0 : index
    %c0_7 = arith.constant 0 : index
    %30 = vector.load %arg6[%c0_6, %c0_7] : memref<48x220xbf16, #tpu.memory_space<vmem>>, vector<48x220xbf16>
    %cst_8 = arith.constant dense<0.000000e+00> : vector<16x220xf32>
    %31 = tpu.matmul %29, %30, %cst_8 {dimension_numbers = #tpu.dot_dimension_numbers<[1], [0], [0], [1], [0, 0, 1, 1], [], []>} : vector<16x48xbf16>, vector<48x220xbf16>, vector<16x220xf32> -> vector<16x220xf32>
    %c0_9 = arith.constant 0 : index
    %c0_10 = arith.constant 0 : index
    %32 = vector.load %arg7[%c0_9, %c0_10] : memref<16x8xbf16, #tpu.memory_space<vmem>>, vector<16x8xbf16>
    %c0_11 = arith.constant 0 : index
    %c0_12 = arith.constant 0 : index
    %33 = vector.load %arg2[%c0_11, %c0_12] : memref<8x220xbf16, #tpu.memory_space<vmem>>, vector<8x220xbf16>
    %cst_13 = arith.constant dense<0.000000e+00> : vector<16x220xf32>
    %34 = tpu.matmul %32, %33, %cst_13 {dimension_numbers = #tpu.dot_dimension_numbers<[1], [0], [0], [1], [0, 0, 1, 1], [], []>} : vector<16x8xbf16>, vector<8x220xbf16>, vector<16x220xf32> -> vector<16x220xf32>
    %35 = arith.addf %34, %31 : vector<16x220xf32>
    %c0_14 = arith.constant 0 : index
    %c0_15 = arith.constant 0 : index
    %36 = vector.load %arg8[%c0_14, %c0_15] : memref<16x1xf32, #tpu.memory_space<vmem>>, vector<16x1xf32>
    %c0_16 = arith.constant 0 : index
    %c0_17 = arith.constant 0 : index
    %37 = vector.load %arg9[%c0_16, %c0_17] : memref<1x220xf32, #tpu.memory_space<vmem>>, vector<1x220xf32>
    %38 = vector.broadcast %36 : vector<16x1xf32> to vector<16x220xf32>
    %39 = vector.broadcast %37 : vector<1x220xf32> to vector<16x220xf32>
    %40 = arith.mulf %38, %39 : vector<16x220xf32>
    %41 = arith.addf %35, %40 : vector<16x220xf32>
    %42 = arith.truncf %41 : vector<16x220xf32> to vector<16x220xbf16>
    %43 = vector.extract_strided_slice %42 {offsets = [0, 0], sizes = [16, 80], strides = [1, 1]} : vector<16x220xbf16> to vector<16x80xbf16>
    %44 = vector.extract_strided_slice %42 {offsets = [0, 1], sizes = [16, 80], strides = [1, 1]} : vector<16x220xbf16> to vector<16x80xbf16>
    %45 = vector.extract_strided_slice %42 {offsets = [0, 2], sizes = [16, 80], strides = [1, 1]} : vector<16x220xbf16> to vector<16x80xbf16>
    %46 = vector.extract_strided_slice %42 {offsets = [0, 10], sizes = [16, 80], strides = [1, 1]} : vector<16x220xbf16> to vector<16x80xbf16>
    %47 = vector.extract_strided_slice %42 {offsets = [0, 11], sizes = [16, 80], strides = [1, 1]} : vector<16x220xbf16> to vector<16x80xbf16>
    %48 = vector.extract_strided_slice %42 {offsets = [0, 12], sizes = [16, 80], strides = [1, 1]} : vector<16x220xbf16> to vector<16x80xbf16>
    %49 = vector.extract_strided_slice %42 {offsets = [0, 20], sizes = [16, 80], strides = [1, 1]} : vector<16x220xbf16> to vector<16x80xbf16>
    %50 = vector.extract_strided_slice %42 {offsets = [0, 21], sizes = [16, 80], strides = [1, 1]} : vector<16x220xbf16> to vector<16x80xbf16>
    %51 = vector.extract_strided_slice %42 {offsets = [0, 22], sizes = [16, 80], strides = [1, 1]} : vector<16x220xbf16> to vector<16x80xbf16>
    %52 = tpu.concatenate %43, %44, %45, %46, %47, %48, %49, %50, %51 in 0 : vector<16x80xbf16>, vector<16x80xbf16>, vector<16x80xbf16>, vector<16x80xbf16>, vector<16x80xbf16>, vector<16x80xbf16>, vector<16x80xbf16>, vector<16x80xbf16>, vector<16x80xbf16> -> vector<144x80xbf16>
    %53 = vector.extract_strided_slice %42 {offsets = [0, 110], sizes = [16, 80], strides = [1, 1]} : vector<16x220xbf16> to vector<16x80xbf16>
    %54 = vector.extract_strided_slice %42 {offsets = [0, 111], sizes = [16, 80], strides = [1, 1]} : vector<16x220xbf16> to vector<16x80xbf16>
    %55 = vector.extract_strided_slice %42 {offsets = [0, 112], sizes = [16, 80], strides = [1, 1]} : vector<16x220xbf16> to vector<16x80xbf16>
    %56 = vector.extract_strided_slice %42 {offsets = [0, 120], sizes = [16, 80], strides = [1, 1]} : vector<16x220xbf16> to vector<16x80xbf16>
    %57 = vector.extract_strided_slice %42 {offsets = [0, 121], sizes = [16, 80], strides = [1, 1]} : vector<16x220xbf16> to vector<16x80xbf16>
    %58 = vector.extract_strided_slice %42 {offsets = [0, 122], sizes = [16, 80], strides = [1, 1]} : vector<16x220xbf16> to vector<16x80xbf16>
    %59 = vector.extract_strided_slice %42 {offsets = [0, 130], sizes = [16, 80], strides = [1, 1]} : vector<16x220xbf16> to vector<16x80xbf16>
    %60 = vector.extract_strided_slice %42 {offsets = [0, 131], sizes = [16, 80], strides = [1, 1]} : vector<16x220xbf16> to vector<16x80xbf16>
    %61 = vector.extract_strided_slice %42 {offsets = [0, 132], sizes = [16, 80], strides = [1, 1]} : vector<16x220xbf16> to vector<16x80xbf16>
    %62 = tpu.concatenate %53, %54, %55, %56, %57, %58, %59, %60, %61 in 0 : vector<16x80xbf16>, vector<16x80xbf16>, vector<16x80xbf16>, vector<16x80xbf16>, vector<16x80xbf16>, vector<16x80xbf16>, vector<16x80xbf16>, vector<16x80xbf16>, vector<16x80xbf16> -> vector<144x80xbf16>
    %63 = tpu.concatenate %52, %62 in 1 : vector<144x80xbf16>, vector<144x80xbf16> -> vector<144x160xbf16>
    %c0_18 = arith.constant 0 : index
    %c0_19 = arith.constant 0 : index
    %64 = vector.load %arg10[%c0_18, %c0_19] : memref<16x144xbf16, #tpu.memory_space<vmem>>, vector<16x144xbf16>
    %cst_20 = arith.constant dense<0.000000e+00> : vector<16x160xf32>
    %65 = tpu.matmul %64, %63, %cst_20 {dimension_numbers = #tpu.dot_dimension_numbers<[1], [0], [0], [1], [0, 0, 1, 1], [], []>} : vector<16x144xbf16>, vector<144x160xbf16>, vector<16x160xf32> -> vector<16x160xf32>
    %c0_21 = arith.constant 0 : index
    %c0_22 = arith.constant 0 : index
    %66 = vector.load %arg11[%c0_21, %c0_22] : memref<16x1xf32, #tpu.memory_space<vmem>>, vector<16x1xf32>
    %67 = vector.broadcast %66 : vector<16x1xf32> to vector<16x160xf32>
    %68 = arith.addf %65, %67 : vector<16x160xf32>
    %cst_23 = arith.constant 0.000000e+00 : f32
    %69 = vector.broadcast %cst_23 : f32 to vector<16x160xf32>
    %70 = arith.maximumf %68, %69 : vector<16x160xf32>
    %71 = arith.truncf %70 : vector<16x160xf32> to vector<16x160xbf16>
    %c0_24 = arith.constant 0 : index
    %c0_25 = arith.constant 0 : index
    %72 = vector.load %arg12[%c0_24, %c0_25] : memref<160x684xbf16, #tpu.memory_space<vmem>>, vector<160x684xbf16>
    %cst_26 = arith.constant dense<0.000000e+00> : vector<16x684xf32>
    %73 = tpu.matmul %71, %72, %cst_26 {dimension_numbers = #tpu.dot_dimension_numbers<[1], [0], [0], [1], [0, 0, 1, 1], [], []>} : vector<16x160xbf16>, vector<160x684xbf16>, vector<16x684xf32> -> vector<16x684xf32>
    %c0_27 = arith.constant 0 : index
    %c0_28 = arith.constant 0 : index
    %74 = vector.load %arg13[%c0_27, %c0_28] : memref<16x4xbf16, #tpu.memory_space<vmem>>, vector<16x4xbf16>
    %c0_29 = arith.constant 0 : index
    %c0_30 = arith.constant 0 : index
    %75 = vector.load %arg3[%c0_29, %c0_30] : memref<4x684xbf16, #tpu.memory_space<vmem>>, vector<4x684xbf16>
    %cst_31 = arith.constant dense<0.000000e+00> : vector<16x684xf32>
    %76 = tpu.matmul %74, %75, %cst_31 {dimension_numbers = #tpu.dot_dimension_numbers<[1], [0], [0], [1], [0, 0, 1, 1], [], []>} : vector<16x4xbf16>, vector<4x684xbf16>, vector<16x684xf32> -> vector<16x684xf32>
    %77 = arith.addf %76, %73 : vector<16x684xf32>
    %c0_32 = arith.constant 0 : index
    %c0_33 = arith.constant 0 : index
    %78 = vector.load %arg14[%c0_32, %c0_33] : memref<16x1xf32, #tpu.memory_space<vmem>>, vector<16x1xf32>
    %c0_34 = arith.constant 0 : index
    %c0_35 = arith.constant 0 : index
    %79 = vector.load %arg15[%c0_34, %c0_35] : memref<1x684xf32, #tpu.memory_space<vmem>>, vector<1x684xf32>
    %80 = vector.broadcast %78 : vector<16x1xf32> to vector<16x684xf32>
    %81 = vector.broadcast %79 : vector<1x684xf32> to vector<16x684xf32>
    %82 = arith.mulf %80, %81 : vector<16x684xf32>
    %83 = arith.addf %77, %82 : vector<16x684xf32>
    %84 = arith.truncf %83 : vector<16x684xf32> to vector<16x684xbf16>
    %85 = vector.extract_strided_slice %84 {offsets = [0, 0], sizes = [16, 288], strides = [1, 1]} : vector<16x684xbf16> to vector<16x288xbf16>
    %86 = vector.extract_strided_slice %84 {offsets = [0, 1], sizes = [16, 288], strides = [1, 1]} : vector<16x684xbf16> to vector<16x288xbf16>
    %87 = vector.extract_strided_slice %84 {offsets = [0, 2], sizes = [16, 288], strides = [1, 1]} : vector<16x684xbf16> to vector<16x288xbf16>
    %88 = vector.extract_strided_slice %84 {offsets = [0, 18], sizes = [16, 288], strides = [1, 1]} : vector<16x684xbf16> to vector<16x288xbf16>
    %89 = vector.extract_strided_slice %84 {offsets = [0, 19], sizes = [16, 288], strides = [1, 1]} : vector<16x684xbf16> to vector<16x288xbf16>
    %90 = vector.extract_strided_slice %84 {offsets = [0, 20], sizes = [16, 288], strides = [1, 1]} : vector<16x684xbf16> to vector<16x288xbf16>
    %91 = vector.extract_strided_slice %84 {offsets = [0, 36], sizes = [16, 288], strides = [1, 1]} : vector<16x684xbf16> to vector<16x288xbf16>
    %92 = vector.extract_strided_slice %84 {offsets = [0, 37], sizes = [16, 288], strides = [1, 1]} : vector<16x684xbf16> to vector<16x288xbf16>
    %93 = vector.extract_strided_slice %84 {offsets = [0, 38], sizes = [16, 288], strides = [1, 1]} : vector<16x684xbf16> to vector<16x288xbf16>
    %94 = tpu.concatenate %85, %86, %87, %88, %89, %90, %91, %92, %93 in 0 : vector<16x288xbf16>, vector<16x288xbf16>, vector<16x288xbf16>, vector<16x288xbf16>, vector<16x288xbf16>, vector<16x288xbf16>, vector<16x288xbf16>, vector<16x288xbf16>, vector<16x288xbf16> -> vector<144x288xbf16>
    %95 = vector.extract_strided_slice %84 {offsets = [0, 342], sizes = [16, 288], strides = [1, 1]} : vector<16x684xbf16> to vector<16x288xbf16>
    %96 = vector.extract_strided_slice %84 {offsets = [0, 343], sizes = [16, 288], strides = [1, 1]} : vector<16x684xbf16> to vector<16x288xbf16>
    %97 = vector.extract_strided_slice %84 {offsets = [0, 344], sizes = [16, 288], strides = [1, 1]} : vector<16x684xbf16> to vector<16x288xbf16>
    %98 = vector.extract_strided_slice %84 {offsets = [0, 360], sizes = [16, 288], strides = [1, 1]} : vector<16x684xbf16> to vector<16x288xbf16>
    %99 = vector.extract_strided_slice %84 {offsets = [0, 361], sizes = [16, 288], strides = [1, 1]} : vector<16x684xbf16> to vector<16x288xbf16>
    %100 = vector.extract_strided_slice %84 {offsets = [0, 362], sizes = [16, 288], strides = [1, 1]} : vector<16x684xbf16> to vector<16x288xbf16>
    %101 = vector.extract_strided_slice %84 {offsets = [0, 378], sizes = [16, 288], strides = [1, 1]} : vector<16x684xbf16> to vector<16x288xbf16>
    %102 = vector.extract_strided_slice %84 {offsets = [0, 379], sizes = [16, 288], strides = [1, 1]} : vector<16x684xbf16> to vector<16x288xbf16>
    %103 = vector.extract_strided_slice %84 {offsets = [0, 380], sizes = [16, 288], strides = [1, 1]} : vector<16x684xbf16> to vector<16x288xbf16>
    %104 = tpu.concatenate %95, %96, %97, %98, %99, %100, %101, %102, %103 in 0 : vector<16x288xbf16>, vector<16x288xbf16>, vector<16x288xbf16>, vector<16x288xbf16>, vector<16x288xbf16>, vector<16x288xbf16>, vector<16x288xbf16>, vector<16x288xbf16>, vector<16x288xbf16> -> vector<144x288xbf16>
    %105 = tpu.concatenate %94, %104 in 1 : vector<144x288xbf16>, vector<144x288xbf16> -> vector<144x576xbf16>
    %c0_36 = arith.constant 0 : index
    %c0_37 = arith.constant 0 : index
    %106 = vector.load %arg16[%c0_36, %c0_37] : memref<16x144xbf16, #tpu.memory_space<vmem>>, vector<16x144xbf16>
    %cst_38 = arith.constant dense<0.000000e+00> : vector<16x576xf32>
    %107 = tpu.matmul %106, %105, %cst_38 {dimension_numbers = #tpu.dot_dimension_numbers<[1], [0], [0], [1], [0, 0, 1, 1], [], []>} : vector<16x144xbf16>, vector<144x576xbf16>, vector<16x576xf32> -> vector<16x576xf32>
    %c0_39 = arith.constant 0 : index
    %c0_40 = arith.constant 0 : index
    %108 = vector.load %arg17[%c0_39, %c0_40] : memref<16x1xf32, #tpu.memory_space<vmem>>, vector<16x1xf32>
    %109 = vector.broadcast %108 : vector<16x1xf32> to vector<16x576xf32>
    %110 = arith.addf %107, %109 : vector<16x576xf32>
    %cst_41 = arith.constant 0.000000e+00 : f32
    %111 = vector.broadcast %cst_41 : f32 to vector<16x576xf32>
    %112 = arith.maximumf %110, %111 : vector<16x576xf32>
    %113 = vector.extract_strided_slice %112 {offsets = [0, 0], sizes = [16, 288], strides = [1, 1]} : vector<16x576xf32> to vector<16x288xf32>
    %c0_42 = arith.constant 0 : index
    %c0_43 = arith.constant 0 : index
    %114 = vector.load %arg18[%c0_42, %c0_43] : memref<288x256xf32, #tpu.memory_space<vmem>>, vector<288x256xf32>
    %cst_44 = arith.constant dense<0.000000e+00> : vector<16x256xf32>
    %115 = tpu.matmul %113, %114, %cst_44 {dimension_numbers = #tpu.dot_dimension_numbers<[1], [0], [0], [1], [0, 0, 1, 1], [], []>} : vector<16x288xf32>, vector<288x256xf32>, vector<16x256xf32> -> vector<16x256xf32>
    %c0_45 = arith.constant 0 : index
    %c0_46 = arith.constant 0 : index
    %c0_47 = arith.constant 0 : index
    %116 = vector.load %arg19[%c0_45, %c0_46, %c0_47] : memref<2x16x256xf32, #tpu.memory_space<vmem>>, vector<1x16x256xf32>
    %117 = vector.shape_cast %116 : vector<1x16x256xf32> to vector<16x256xf32>
    %118 = vector.shape_cast %115 : vector<16x256xf32> to vector<1x16x256xf32>
    tpu.vector_store %arg19[%c0_45, %c0_46, %c0_47], %118 {strides = array<i32>} : memref<2x16x256xf32, #tpu.memory_space<vmem>>, vector<1x16x256xf32>,
    %119 = vector.extract_strided_slice %112 {offsets = [0, 288], sizes = [16, 288], strides = [1, 1]} : vector<16x576xf32> to vector<16x288xf32>
    %c0_48 = arith.constant 0 : index
    %c0_49 = arith.constant 0 : index
    %120 = vector.load %arg18[%c0_48, %c0_49] : memref<288x256xf32, #tpu.memory_space<vmem>>, vector<288x256xf32>
    %cst_50 = arith.constant dense<0.000000e+00> : vector<16x256xf32>
    %121 = tpu.matmul %119, %120, %cst_50 {dimension_numbers = #tpu.dot_dimension_numbers<[1], [0], [0], [1], [0, 0, 1, 1], [], []>} : vector<16x288xf32>, vector<288x256xf32>, vector<16x256xf32> -> vector<16x256xf32>
    %c1 = arith.constant 1 : index
    %c0_51 = arith.constant 0 : index
    %c0_52 = arith.constant 0 : index
    %122 = vector.load %arg19[%c1, %c0_51, %c0_52] : memref<2x16x256xf32, #tpu.memory_space<vmem>>, vector<1x16x256xf32>
    %123 = vector.shape_cast %122 : vector<1x16x256xf32> to vector<16x256xf32>
    %124 = vector.shape_cast %121 : vector<16x256xf32> to vector<1x16x256xf32>
    tpu.vector_store %arg19[%c1, %c0_51, %c0_52], %124 {strides = array<i32>} : memref<2x16x256xf32, #tpu.memory_space<vmem>>, vector<1x16x256xf32>,
    return
  }
  func.func @transform_0(%arg0: i32) -> (i32, i32) {
    %c0_i32 = arith.constant 0 : i32
    %c0_i32_0 = arith.constant 0 : i32
    %c0_i32_1 = arith.constant 0 : i32
    return %c0_i32, %c0_i32_0 : i32, i32
  }
  func.func @transform_1(%arg0: i32) -> (i32, i32) {
    %c0_i32 = arith.constant 0 : i32
    %c0_i32_0 = arith.constant 0 : i32
    %c0_i32_1 = arith.constant 0 : i32
    return %c0_i32, %c0_i32_0 : i32, i32
  }
  func.func @transform_2(%arg0: i32) -> (i32, i32) {
    %c0_i32 = arith.constant 0 : i32
    %c0_i32_0 = arith.constant 0 : i32
    %c0_i32_1 = arith.constant 0 : i32
    return %c0_i32, %c0_i32_0 : i32, i32
  }
  func.func @transform_3(%arg0: i32) -> (i32, i32) {
    %c0_i32 = arith.constant 0 : i32
    %c0_i32_0 = arith.constant 0 : i32
    %c0_i32_1 = arith.constant 0 : i32
    return %c0_i32, %c0_i32_0 : i32, i32
  }
  func.func @transform_4(%arg0: i32) -> (i32, i32) {
    %c0_i32 = arith.constant 0 : i32
    %c0_i32_0 = arith.constant 0 : i32
    %c0_i32_1 = arith.constant 0 : i32
    return %c0_i32, %c0_i32_0 : i32, i32
  }
  func.func @transform_5(%arg0: i32) -> (i32, i32) {
    %c0_i32 = arith.constant 0 : i32
    %c0_i32_0 = arith.constant 0 : i32
    %c0_i32_1 = arith.constant 0 : i32
    return %c0_i32, %c0_i32_0 : i32, i32
  }
  func.func @transform_6(%arg0: i32) -> (i32, i32) {
    %c0_i32 = arith.constant 0 : i32
    %c0_i32_0 = arith.constant 0 : i32
    %c0_i32_1 = arith.constant 0 : i32
    return %c0_i32, %c0_i32_0 : i32, i32
  }
  func.func @transform_7(%arg0: i32) -> (i32, i32) {
    %c0_i32 = arith.constant 0 : i32
    %c0_i32_0 = arith.constant 0 : i32
    %c0_i32_1 = arith.constant 0 : i32
    return %c0_i32, %c0_i32_0 : i32, i32
  }
  func.func @transform_8(%arg0: i32) -> (i32, i32) {
    %c0_i32 = arith.constant 0 : i32
    %c0_i32_0 = arith.constant 0 : i32
    %c0_i32_1 = arith.constant 0 : i32
    return %c0_i32, %c0_i32_0 : i32, i32
  }
  func.func @transform_9(%arg0: i32) -> (i32, i32) {
    %c0_i32 = arith.constant 0 : i32
    %c0_i32_0 = arith.constant 0 : i32
    %c0_i32_1 = arith.constant 0 : i32
    return %c0_i32, %c0_i32_0 : i32, i32
  }
  func.func @transform_10(%arg0: i32) -> (i32, i32) {
    %c0_i32 = arith.constant 0 : i32
    %c0_i32_0 = arith.constant 0 : i32
    %c0_i32_1 = arith.constant 0 : i32
    return %c0_i32, %c0_i32_0 : i32, i32
  }
  func.func @transform_11(%arg0: i32) -> (i32, i32) {
    %c0_i32 = arith.constant 0 : i32
    %c0_i32_0 = arith.constant 0 : i32
    %c0_i32_1 = arith.constant 0 : i32
    return %c0_i32, %c0_i32_0 : i32, i32
  }
  func.func @transform_12(%arg0: i32) -> (i32, i32) {
    %c0_i32 = arith.constant 0 : i32
    %c0_i32_0 = arith.constant 0 : i32
    %c0_i32_1 = arith.constant 0 : i32
    return %c0_i32, %c0_i32_0 : i32, i32
  }
  func.func @transform_13(%arg0: i32) -> (i32, i32) {
    %c0_i32 = arith.constant 0 : i32
    %c0_i32_0 = arith.constant 0 : i32
    %c0_i32_1 = arith.constant 0 : i32
    return %c0_i32, %c0_i32_0 : i32, i32
  }
  func.func @transform_14(%arg0: i32) -> (i32, i32) {
    %c0_i32 = arith.constant 0 : i32
    %c0_i32_0 = arith.constant 0 : i32
    %c0_i32_1 = arith.constant 0 : i32
    return %c0_i32, %c0_i32_0 : i32, i32
  }
  func.func @transform_15(%arg0: i32) -> (i32, i32) {
    %c0_i32 = arith.constant 0 : i32
    %c0_i32_0 = arith.constant 0 : i32
    %c0_i32_1 = arith.constant 0 : i32
    return %c0_i32, %c0_i32_0 : i32, i32
  }
  func.func @transform_16(%arg0: i32) -> (i32, i32) {
    %c0_i32 = arith.constant 0 : i32
    %c0_i32_0 = arith.constant 0 : i32
    %c0_i32_1 = arith.constant 0 : i32
    return %c0_i32, %c0_i32_0 : i32, i32
  }
  func.func @transform_17(%arg0: i32) -> (i32, i32) {
    %c0_i32 = arith.constant 0 : i32
    %c0_i32_0 = arith.constant 0 : i32
    %c0_i32_1 = arith.constant 0 : i32
    return %c0_i32, %c0_i32_0 : i32, i32
  }
  func.func @transform_18(%arg0: i32) -> (i32, i32, i32) {
    %c0_i32 = arith.constant 0 : i32
    %c0_i32_0 = arith.constant 0 : i32
    %c0_i32_1 = arith.constant 0 : i32
    %c0_i32_2 = arith.constant 0 : i32
    return %c0_i32, %c0_i32_0, %c0_i32_1 : i32, i32, i32
  }
}

</mosaic_0001>

<bundles_post_ra>
// kernel: tpu_custom_call.1
= control target key start
LH: loop header
LB: loop body
LE: loop exit
PB: predicated region body
PF: predicated region fallthrough
CT: control target
= control target key end

     0   :  { %s3606_s0 = inlined_call_operand.hbm [shape: bf16[16,84], index: 0, kind: input, shape index: {}]   ;;  %s3607_s1 = inlined_call_operand.hbm [shape: bf16[8,220], index: 1, kind: input, shape index: {}]   ;;  %s3608_s2 = inlined_call_operand.vmem [shape: bf16[4,684], index: 2, kind: input, shape index: {}]   ;;  %s3609_s3 = inlined_call_operand.vmem [shape: bf16[16,144], index: 3, kind: input, shape index: {}]   ;;  %s3610_s4 = inlined_call_operand.vmem [shape: f32[16,1], index: 4, kind: input, shape index: {}]   ;;  %s3611_s5 = inlined_call_operand.vmem [shape: bf16[48,220], index: 5, kind: input, shape index: {}]   ;;  %s3612_s6 = inlined_call_operand.vmem [shape: bf16[16,8], index: 6, kind: input, shape index: {}]   ;;  %s3613_s7 = inlined_call_operand.vmem [shape: f32[16,1], index: 7, kind: input, shape index: {}]   ;;  %s3614_s8 = inlined_call_operand.vmem [shape: f32[1,220], index: 8, kind: input, shape index: {}]   ;;  %s3615_s9 = inlined_call_operand.vmem [shape: bf16[16,144], index: 9, kind: input, shape index: {}]   ;;  %s3616_s10 = inlined_call_operand.vmem [shape: f32[16,1], index: 10, kind: input, shape index: {}]   ;;  %s3617_s11 = inlined_call_operand.hbm [shape: bf16[160,684], index: 11, kind: input, shape index: {}]   ;;  %s3618_s12 = inlined_call_operand.vmem [shape: bf16[16,4], index: 12, kind: input, shape index: {}]   ;;  %s3619_s13 = inlined_call_operand.vmem [shape: f32[16,1], index: 13, kind: input, shape index: {}]   ;;  %s3620_s14 = inlined_call_operand.vmem [shape: f32[1,684], index: 14, kind: input, shape index: {}]   ;;  %s3621_s15 = inlined_call_operand.vmem [shape: bf16[16,144], index: 15, kind: input, shape index: {}]   ;;  %s3622_s16 = inlined_call_operand.vmem [shape: f32[16,1], index: 16, kind: input, shape index: {}]   ;;  %s3623_s17 = inlined_call_operand.hbm [shape: f32[288,256], index: 17, kind: input, shape index: {}]   ;;  %s3624_s18 = inlined_call_operand.hbm [shape: f32[2,16,256], index: 18, kind: output, shape index: {}]  }
   0x1   :  { %3629 = sst [smem:[#allocation15_spill]] %s3606_s0 }
   0x2   :  { %3630 = sst [smem:[#allocation16_spill]] %s3607_s1 }
   0x3   :  { %3631 = sst [smem:[#allocation17_spill]] %s3608_s2 }
   0x4   :  { %3632 = sst [smem:[#allocation18_spill]] %s3624_s18 }
   0x5   :  { %23 = vsyncpa [#allocation3], 0 }
   0x6   :  { %24 = vsyncpa [#allocation6], 0 }
   0x7   :  { %25 = vsyncpa [#allocation9], 0 }
   0x8   :  { %26 = vsyncpa [#allocation4], 0  ;;  %s2917_s27 = smov [#allocation5]   ;;  %s2918_s29 = smov [#allocation2]  }
   0x9   :  { %s45_s28 = sshll.u32 %s2917_s27, 4  ;;  %s32_s30 = sshll.u32 %s2918_s29, 4  ;;  %s46_s28 = int_to_ptr.vmem [resolvable:$true] %s45_s28  ;;  %s3047_s30 = int_to_ptr.vmem [resolvable:$true] %s32_s30 }
   0xa   :  { %s3633_s1 = sld [smem:[#allocation16_spill]] }
  0x10   :  { %s2799_s20 = scalar_lea.hbm %s3633_s1, 128 }
  0x11   :  { %p2800_p0 = scmp.ne.s32.totalorder %s3633_s1, %s2799_s20  ;;  %p2803_p1 = scmp.lt.u32.totalorder %s2799_s20, %s3633_s1 }
  0x13   :  { %p2805_p2 = pnand %p2803_p1, %p2800_p0 }
  0x15   :  { %2808 = shalt.err (!%p2805_p2)
}
  0x16   :  { %s2809_s24 = scalar_lea.vmem %s46_s28, 128  ;;  %p2814_p4 = scmp.lt.s32.totalorder %s46_s28, %s46_s28 }
  0x17   :  { %p2810_p3 = scmp.ne.s32.totalorder %s46_s28, %s2809_s24  ;;  %p2815_p5 = scmp.lt.s32.totalorder %s2809_s24, %s2809_s24 }
  0x19   :  { %p2816_p6 = por %p2815_p5, %p2814_p4 }
  0x1b   :  { %p2817_p7 = pnand %p2816_p6, %p2810_p3 }
  0x1d   :  { %2820 = shalt.err (!%p2817_p7)
}
  0x1e   :  { %48 = dma.hbm_to_vmem [thread:$0]  %s3633_s1, 128, %s46_s28, [#allocation6]  }
  0x1f   :  { %s3634_s0 = sld [smem:[#allocation15_spill]] }
  0x25   :  { %s2821_s19 = scalar_lea.hbm %s3634_s0, 128 }
  0x26   :  { %p2822_p8 = scmp.ne.s32.totalorder %s3634_s0, %s2821_s19  ;;  %p2825_p9 = scmp.lt.u32.totalorder %s2821_s19, %s3634_s0 }
  0x28   :  { %p2827_p10 = pnand %p2825_p9, %p2822_p8 }
  0x2a   :  { %2830 = shalt.err (!%p2827_p10)
}
  0x2b   :  { %s2831_s23 = scalar_lea.vmem %s3047_s30, 128  ;;  %p2836_p12 = scmp.lt.s32.totalorder %s3047_s30, %s3047_s30 }
  0x2c   :  { %p2832_p11 = scmp.ne.s32.totalorder %s3047_s30, %s2831_s23  ;;  %p2837_p13 = scmp.lt.s32.totalorder %s2831_s23, %s2831_s23 }
  0x2e   :  { %p2838_p0 = por %p2837_p13, %p2836_p12 }
  0x30   :  { %p2839_p1 = pnand %p2838_p0, %p2832_p11 }
  0x32   :  { %2842 = shalt.err (!%p2839_p1)
}
  0x33   :  { %s2919_s28 = smov 64   ;;  %s2920_s1 = smov 4  }
  0x34   :  { %38 = dma.hbm_to_vmem [thread:$0]  %s3634_s0, 128, %s3047_s30, [#allocation3], %s2919_s28, %s2919_s28, %s2920_s1  }
  0x35   :  { %s2921_s26 = smov [#allocation7]   ;;  %s2843_s21 = scalar_lea.hbm %s3617_s11, 7680 }
  0x36   :  { %s72_s27 = sshll.u32 %s2921_s26, 4  ;;  %p2844_p2 = scmp.ne.s32.totalorder %s3617_s11, %s2843_s21  ;;  %s73_s27 = int_to_ptr.vmem [resolvable:$true] %s72_s27 }
  0x37   :  { %p2847_p3 = scmp.lt.u32.totalorder %s2843_s21, %s3617_s11 }
  0x39   :  { %p2849_p4 = pnand %p2847_p3, %p2844_p2 }
  0x3b   :  { %2852 = shalt.err (!%p2849_p4)
}
  0x3c   :  { %s2853_s18 = scalar_lea.vmem %s73_s27, 7680  ;;  %p2858_p6 = scmp.lt.s32.totalorder %s73_s27, %s73_s27 }
  0x3d   :  { %p2854_p5 = scmp.ne.s32.totalorder %s73_s27, %s2853_s18  ;;  %p2859_p7 = scmp.lt.s32.totalorder %s2853_s18, %s2853_s18 }
  0x3f   :  { %p2860_p8 = por %p2859_p7, %p2858_p6 }
  0x41   :  { %p2861_p9 = pnand %p2860_p8, %p2854_p5 }
  0x43   :  { %2864 = shalt.err (!%p2861_p9)
}
  0x44   :  { %s2922_s30 = smov 384   ;;  %s2923_s0 = smov 24  }
  0x45   :  { %78 = dma.hbm_to_vmem [thread:$0]  %s3617_s11, 7680, %s73_s27, [#allocation6], %s2922_s30, %s2922_s30, %s2923_s0  }
  0x46   :  { %s2924_s24 = smov [#allocation8]   ;;  %s2865_s19 = scalar_lea.hbm %s3623_s17, 9216 }
  0x47   :  { %s94_s25 = sshll.u32 %s2924_s24, 4  ;;  %p2866_p10 = scmp.ne.s32.totalorder %s3623_s17, %s2865_s19  ;;  %s95_s25 = int_to_ptr.vmem [resolvable:$true] %s94_s25 }
  0x48   :  { %p2869_p11 = scmp.lt.u32.totalorder %s2865_s19, %s3623_s17 }
  0x4a   :  { %p2871_p12 = pnand %p2869_p11, %p2866_p10 }
  0x4c   :  { %2874 = shalt.err (!%p2871_p12)
}
  0x4d   :  { %s2875_s2 = scalar_lea.vmem %s95_s25, 9216  ;;  %p2880_p0 = scmp.lt.s32.totalorder %s95_s25, %s95_s25 }
  0x4e   :  { %p2876_p13 = scmp.ne.s32.totalorder %s95_s25, %s2875_s2  ;;  %p2881_p1 = scmp.lt.s32.totalorder %s2875_s2, %s2875_s2 }
  0x50   :  { %p2882_p2 = por %p2881_p1, %p2880_p0 }
  0x52   :  { %p2883_p3 = pnand %p2882_p2, %p2876_p13 }
  0x54   :  { %2886 = shalt.err (!%p2883_p3)
}
  0x55   :  { %s2925_s11 = smov 256   ;;  %s2926_s27 = smov 16  }
  0x56   :  { %100 = dma.hbm_to_vmem [thread:$0]  %s3623_s17, 9216, %s95_s25, [#allocation9], %s2925_s11, %s2925_s11, %s2926_s27  }
  0x57   :  { %2909 = dma.done.wait [#allocation3], 128  }
  0x58   :  { %2910 = vsyncadd [#allocation3], 4294967168 }
  0x59   :  { %2911 = dma.done.wait [#allocation6], 7808  }
  0x5a   :  { %2912 = vsyncadd [#allocation6], 4294959488 }
  0x5b   :  { %2913 = dma.done.wait [#allocation9], 9216  }
  0x5c   :  { %2914 = vsyncadd [#allocation9], 4294958080  ;;  %v2685_v0 = vld [vmem:[#allocation2] sm:$0xff]   ;;  %s2927_s0 = smov 127   ;;  %s2928_s28 = smov 122   ;;  %v2931_v1 = vmov 0   ;;  %v427_v56 = vlaneseq }
  0x5d   :  { %121 = vrot.lane.b32.xlu0 %v2685_v0, %s2927_s0  ;;  %125 = vrot.lane.b32.xlu1 %v2685_v0, %s2928_s28  ;;  %s2929_s1 = smov 126   ;;  %s2930_s24 = smov 121   ;;  %vm155_vm0 = vcmask 195584   ;;  %v2688_v12 = vld [vmem:[%s3609_s3 + $0x4] ss:$8 sps:$4 sm:$0xff]   ;;  %vm215_vm1 = vcmask 130048  }
  0x5e   :  { %219 = vmatprep.subr.bf16.mxu0 %v2931_v1  ;;  %2673 = vset.pattern.permute.xlu1 %v2931_v1  ;;  %s2932_s17 = smov 120   ;;  %s2933_s25 = smov 116   ;;  %v194_v13 = vld [vmem:[%s3610_s4] sm:$0xff]  ;;  %v195_v14 = vld [vmem:[%s3610_s4 + $0x8] sm:$0xff]  ;;  %v2692_v36 = vld [vmem:[%s3611_s5 + $0x14] ss:$8 sps:$4 sm:$0xff]  }
  0x5f   :  { %2674 = vset.pattern.permute.xlu0 %v2931_v1  ;;  %335 = vmatprep.mubr.bf16.mxu1 %v2931_v1  ;;  %s2934_s26 = smov 115   ;;  %s2935_s29 = smov 114   ;;  %v2689_v15 = vld [vmem:[%s3611_s5 + $0x4] ss:$8 sps:$4 sm:$0xff]   ;;  %v2691_v16 = vld [vmem:[%s3611_s5] ss:$8 sps:$4 sm:$0xff]  }
  0x60   :  { %s2936_s19 = smov 110   ;;  %2370 = vmatprep.mubr.msk.bf16.mxu0 %vm215_vm1, %v2688_v12  ;;  %v413_v17 = vld [vmem:[%s3613_s7] sm:$0xff]  ;;  %303 = vmatprep.subr.bf16.mxu1 %v2689_v15  ;;  %v414_v18 = vld [vmem:[%s3613_s7 + $0x8] sm:$0xff]  ;;  %v2694_v37 = vld [vmem:[%s3611_s5 + $0x10] ss:$8 sps:$4 sm:$0xff]   ;;  %vm363_vm2 = vcmask 1043456  }
  0x61   :  { %123 = vrot.lane.b32.xlu0 %v2685_v0, %s2929_s1  ;;  %127 = vrot.lane.b32.xlu1 %v2685_v0, %s2930_s24  ;;  %v2686_v35 = vld [vmem:[%s3609_s3] ss:$8 sps:$4 sm:$0xff]   ;;  %v2695_v38 = vld [vmem:[%s3611_s5 + $0x24] ss:$8 sps:$4 sm:$0xff]   ;;  %vm299_vm3 = vcmask 392192   ;;  %vm359_vm4 = vcmask 64512  }
  0x62   :  { %304 = vmatpush1.bf16.msra.mxu1 %v2691_v16  ;;  %v2697_v39 = vld [vmem:[%s3611_s5 + $0x20] ss:$8 sps:$4 sm:$0xff]   ;;  %v3179_v57 = vshrl.u32 %v427_v56, 7  ;;  %s2939_s21 = smov 108   ;;  %s2940_s22 = smov 107   ;;  %vm467_vm5 = vcmask 1039360  }
  0x63   :  { %305 = vmatprep.subr.bf16.mxu1 %v2692_v36  ;;  %v348_v40 = vld [vmem:[#allocation5] sm:$0xff]  ;;  %v2700_v55 = vld [vmem:[%s3612_s6] sm:$0xff]   ;;  %s2937_s6 = smov 118   ;;  %s2941_s4 = smov 106   ;;  %vm471_vm6 = vcmask 1031168   ;;  %vm475_vm7 = vcmask 965632  }
  0x64   :  { %v2380_v41 = vcombine.high %v348_v40, %v348_v40  ;;  %v2379_v42 = vcombine.low %v348_v40, %v348_v40  ;;  %v429_v59 = vsub.s32 0, %v3179_v57  ;;  %v415_v60 = vld [vmem:[%s3614_s8] sm:$0x3]  ;;  %v433_v61 = vsub.s32 1, %v3179_v57  ;;  %s2938_s8 = smov 117   ;;  %s2942_s7 = smov 98  }
  0x65   :  { %129 = vrot.lane.b32.xlu0 %v2685_v0, %s2932_s17  ;;  %131 = vrot.lane.b32.xlu1 %v2685_v0, %s2933_s25  ;;  %vm479_vm8 = vcmask 957440   ;;  %vm483_vm9 = vcmask 949248   ;;  %vm521_vm10 = vcmask 801792   ;;  %vm537_vm11 = vcmask 654336   ;;  %v576_v40 = vld [vmem:[%s3616_s10] sm:$0xff]  ;;  %s2947_s18 = smov 92  }
  0x66   :  { %306 = vmatpush1.bf16.msra.mxu1 %v2694_v37  ;;  %v365_v43 = vsel %vm363_vm2, %v2379_v42, 0  ;;  %v430_v62 = vrot.slane %v415_v60, %v429_v59  ;;  %v1330_v42 = vld [vmem:[%s3619_s13] sm:$0xff]  ;;  %v2740_v56 = vld [vmem:[#allocation7 + $0x120] ss:$24 sps:$4 sm:$0xff]   ;;  %vm1182_vm12 = vcmask 1041408   ;;  %vm1009_vm13 = vcmask 261120  }
  0x67   :  { %307 = vmatprep.subr.bf16.mxu1 %v2695_v38  ;;  %vm1178_vm14 = vcmask 31744   ;;  %vm1433_vm15 = vcmask 900096  }
  0x69   :  { %133 = vrot.lane.b32.xlu0 %v2685_v0, %s2934_s26  ;;  %135 = vrot.lane.b32.xlu1 %v2685_v0, %s2935_s29  ;;  %s3635_s26 = sld [smem:[#allocation17_spill]] }
  0x6a   :  { %308 = vmatpush1.bf16.msra.mxu1 %v2697_v39  ;;  %v577_v39 = vld [vmem:[%s3616_s10 + $0x8] sm:$0xff] }
  0x6b   :  { %2381 = vmatprep.subr.msk.bf16.mxu1 %vm363_vm2, %v2380_v41  ;;  %v1331_v41 = vld [vmem:[%s3619_s13 + $0x8] sm:$0xff]  ;;  %vm1455_vm2 = vcmask 883712  }
  0x6d   :  { %137 = vrot.lane.b32.xlu0 %v2685_v0, %s2936_s19 }
  0xcf   :  { %v122_v2 = vpop.permute.xlu0 %121  ;;  %v126_v3 = vpop.permute.xlu1 %125 }
  0xd0   :  { %139 = vrot.lane.b32.xlu1 %v122_v2, %s2936_s19 }
  0xd3   :  { %v124_v4 = vpop.permute.xlu0 %123  ;;  %v128_v5 = vpop.permute.xlu1 %127 }
  0xd4   :  { %143 = vrot.lane.b32.xlu1 %v126_v3, %s2936_s19  ;;  %141 = vrot.lane.b32.xlu0 %v124_v4, %s2936_s19 }
  0xd7   :  { %v130_v6 = vpop.permute.xlu0 %129  ;;  %v132_v7 = vpop.permute.xlu1 %131 }
  0xd8   :  { %145 = vrot.lane.b32.xlu0 %v128_v5, %s2936_s19  ;;  %147 = vrot.lane.b32.xlu1 %v130_v6, %s2936_s19 }
  0xdb   :  { %v134_v8 = vpop.permute.xlu0 %133  ;;  %v136_v9 = vpop.permute.xlu1 %135 }
  0xdc   :  { %149 = vrot.lane.b32.xlu0 %v132_v7, %s2936_s19  ;;  %151 = vrot.lane.b32.xlu1 %v134_v8, %s2936_s19 }
  0xdf   :  { %v138_v10 = vpop.permute.xlu0 %137 }
  0xe0   :  { %153 = vrot.lane.b32.xlu0 %v136_v9, %s2936_s19  ;;  %v158_v11 = vsel %vm155_vm0, %v2685_v0, %v138_v10  ;;  %198 = vperm.xlu1 %2673, %v194_v13   ;;  %v434_v0 = vrot.slane %v415_v60, %v433_v61  ;;  %v2746_v60 = vld [vmem:[#allocation7 + $0x150] ss:$24 sps:$4 sm:$0xff]  }
  0xe1   :  { %220 = vmatpush1.bf16.msra.mxu0 %v158_v11 }
  0xe2   :  { %221 = vmatprep.subr.bf16.mxu0 %v2931_v1 }
  0xe4   :  { %203 = vperm.xlu0 %2674, %v195_v14   ;;  %418 = vperm.xlu1 %2673, %v413_v17  }
  0xe8   :  { %423 = vperm.xlu1 %2673, %v414_v18  }
 0x142   :  { %v140_v19 = vpop.permute.xlu1 %139 }
 0x143   :  { %v162_v20 = vsel %vm155_vm0, %v122_v2, %v140_v19 }
 0x144   :  { %222 = vmatpush1.bf16.msra.mxu0 %v162_v20 }
 0x145   :  { %223 = vmatprep.subr.bf16.mxu0 %v2931_v1 }
 0x146   :  { %v142_v21 = vpop.permute.xlu0 %141  ;;  %v144_v23 = vpop.permute.xlu1 %143 }
 0x147   :  { %v166_v22 = vsel %vm155_vm0, %v124_v4, %v142_v21  ;;  %v170_v24 = vsel %vm155_vm0, %v126_v3, %v144_v23 }
 0x148   :  { %224 = vmatpush1.bf16.msra.mxu0 %v166_v22 }
 0x149   :  { %225 = vmatprep.subr.bf16.mxu0 %v2931_v1 }
 0x14a   :  { %v146_v25 = vpop.permute.xlu0 %145  ;;  %v148_v27 = vpop.permute.xlu1 %147 }
 0x14b   :  { %v174_v26 = vsel %vm155_vm0, %v128_v5, %v146_v25  ;;  %v178_v28 = vsel %vm155_vm0, %v130_v6, %v148_v27 }
 0x14c   :  { %226 = vmatpush1.bf16.msra.mxu0 %v170_v24 }
 0x14d   :  { %227 = vmatprep.subr.bf16.mxu0 %v2931_v1 }
 0x14e   :  { %v150_v29 = vpop.permute.xlu0 %149  ;;  %v152_v31 = vpop.permute.xlu1 %151 }
 0x14f   :  { %v182_v30 = vsel %vm155_vm0, %v132_v7, %v150_v29  ;;  %v186_v32 = vsel %vm155_vm0, %v134_v8, %v152_v31 }
 0x150   :  { %228 = vmatpush1.bf16.msra.mxu0 %v174_v26 }
 0x151   :  { %229 = vmatprep.subr.bf16.mxu0 %v2931_v1 }
 0x152   :  { %v154_v33 = vpop.permute.xlu0 %153 }
 0x153   :  { %v190_v34 = vsel %vm155_vm0, %v136_v9, %v154_v33  ;;  %vm1444_vm0 = vcmask 891904  }
 0x154   :  { %230 = vmatpush1.bf16.msra.mxu0 %v178_v28 }
 0x155   :  { %231 = vmatprep.subr.bf16.mxu0 %v2931_v1 }
 0x158   :  { %232 = vmatpush1.bf16.msra.mxu0 %v182_v30 }
 0x159   :  { %233 = vmatprep.subr.bf16.mxu0 %v2931_v1 }
 0x15c   :  { %234 = vmatpush1.bf16.msra.mxu0 %v186_v32  ;;  %v2701_v32 = vld [vmem:[%s3615_s9 + $0x4] ss:$8 sps:$4 sm:$0xff]  }
 0x15d   :  { %235 = vmatprep.subr.bf16.mxu0 %v2931_v1 }
 0x15f   :  { %v199_v44 = vpop.permute.xlu1 %198 }
 0x160   :  { %236 = vmatpush1.bf16.msra.mxu0 %v190_v34 }
 0x163   :  { %252 = vmatmul.mubr.bf16.vlgmr.msra.gmra.mrb[0].mxu0 %v2686_v35  ;;  %v204_v46 = vpop.permute.xlu0 %203  ;;  %v419_v58 = vpop.permute.xlu1 %418 }
 0x164   :  { %v437_v3 = vmul.f32 %v430_v62, %v419_v58  ;;  %v438_v6 = vmul.f32 %v434_v0, %v419_v58  ;;  %v2748_v58 = vld [vmem:[#allocation7 + $0x154] ss:$24 sps:$4 sm:$0xff]  }
 0x167   :  { %v424_v63 = vpop.permute.xlu1 %423 }
 0x168   :  { %v439_v5 = vmul.f32 %v430_v62, %v424_v63  ;;  %v440_v8 = vmul.f32 %v434_v0, %v424_v63 }
 0x236   :  { %v253_v45 = vpop.f32.mrb[0].mxu0 }
 0x237   :  { %v254_v47 = vadd.f32 %v253_v45, %v199_v44  ;;  %v255_v48 = vpop.f32.mrb[1].mxu0  ;;  %v2706_v44 = vld [vmem:[#allocation7 + $0x4] ss:$24 sps:$4 sm:$0xff]   ;;  %v2712_v45 = vld [vmem:[#allocation7 + $0x34] ss:$24 sps:$4 sm:$0xff]  }
 0x238   :  { %v256_v49 = vpop.f32.mrb[2].mxu0  ;;  %1013 = vmatprep.subr.bf16.mxu0 %v2706_v44  ;;  %v2716_v48 = vld [vmem:[#allocation7 + $0x60] ss:$24 sps:$4 sm:$0xff]  }
 0x239   :  { %v257_v50 = vadd.f32 %v256_v49, %v204_v46  ;;  %v258_v51 = vpop.f32.mrb[3].mxu0  ;;  %v260_v52 = vmax.f32 %v254_v47, 0.0  ;;  %v2710_v46 = vld [vmem:[#allocation7 + $0x30] ss:$24 sps:$4 sm:$0xff]   ;;  %v2718_v47 = vld [vmem:[#allocation7 + $0x64] ss:$24 sps:$4 sm:$0xff]  }
 0x23a   :  { %v2724_v49 = vld [vmem:[#allocation7 + $0x94] ss:$24 sps:$4 sm:$0xff]   ;;  %v2730_v51 = vld [vmem:[#allocation7 + $0xc4] ss:$24 sps:$4 sm:$0xff]   ;;  %v2749_v44 = vld [vmem:[#allocation7 + $0x158] ss:$24 sps:$4 sm:$0xff]  }
 0x23b   :  { %v261_v53 = vmax.f32 %v257_v50, 0.0  ;;  %v2722_v50 = vld [vmem:[#allocation7 + $0x90] ss:$24 sps:$4 sm:$0xff]  }
 0x23d   :  { %v262_v54 = vpack.c.bf16 %v261_v53, %v260_v52  ;;  %v2728_v52 = vld [vmem:[#allocation7 + $0xc0] ss:$24 sps:$4 sm:$0xff]   ;;  %v2736_v53 = vld [vmem:[#allocation7 + $0xf4] ss:$24 sps:$4 sm:$0xff]  }
 0x23f   :  { %2377 = vmatmul.mubr.msk.bf16.vlgmr.msra.gmra.mrb[0].mxu1 %vm299_vm3, %v262_v54  ;;  %v2734_v54 = vld [vmem:[#allocation7 + $0xf0] ss:$24 sps:$4 sm:$0xff]   ;;  %vm1466_vm3 = vcmask 752640  }
 0x240   :  { %371 = vmatpush1.bf16.msra.mxu1 %v365_v43  ;;  %402 = vmatprep.mubr.bf16.mxu1 %v2931_v1  ;;  %v2704_v43 = vld [vmem:[#allocation7] ss:$24 sps:$4 sm:$0xff]  }
 0x241   :  { %1014 = vmatpush1.bf16.msra.mxu0 %v2704_v43  ;;  %v2751_v43 = vld [vmem:[#allocation7 + $0x15c] ss:$24 sps:$4 sm:$0xff]  }
 0x242   :  { %1015 = vmatprep.subr.bf16.mxu0 %v2712_v45  ;;  %v2754_v45 = vld [vmem:[#allocation7 + $0x184] ss:$24 sps:$4 sm:$0xff]  }
 0x245   :  { %1016 = vmatpush1.bf16.msra.mxu0 %v2710_v46  ;;  %v2752_v46 = vld [vmem:[#allocation7 + $0x180] ss:$24 sps:$4 sm:$0xff]  }
 0x246   :  { %1017 = vmatprep.subr.bf16.mxu0 %v2718_v47  ;;  %v2757_v47 = vld [vmem:[#allocation7 + $0x18c] ss:$24 sps:$4 sm:$0xff]  }
 0x249   :  { %1018 = vmatpush1.bf16.msra.mxu0 %v2716_v48  ;;  %v2755_v48 = vld [vmem:[#allocation7 + $0x188] ss:$24 sps:$4 sm:$0xff]  }
 0x24a   :  { %1019 = vmatprep.subr.bf16.mxu0 %v2724_v49  ;;  %v2760_v49 = vld [vmem:[#allocation7 + $0x1b4] ss:$24 sps:$4 sm:$0xff]  }
 0x24b   :  { %2382 = vmatmul.mubr.msk.bf16.vlgmr.msra.gmra.mrb[0].mxu1 %vm359_vm4, %v2700_v55  ;;  %v2742_v55 = vld [vmem:[#allocation7 + $0x124] ss:$24 sps:$4 sm:$0xff]   ;;  %vm1477_vm4 = vcmask 744448  }
 0x24c   :  { %2385 = vmatprep.mubr.msk.bf16.mxu1 %vm215_vm1, %v2701_v32  ;;  %v2713_v32 = vld [vmem:[#allocation7 + $0x38] ss:$24 sps:$4 sm:$0xff]  }
 0x24d   :  { %1020 = vmatpush1.bf16.msra.mxu0 %v2722_v50  ;;  %v2758_v50 = vld [vmem:[#allocation7 + $0x1b0] ss:$24 sps:$4 sm:$0xff]  }
 0x24e   :  { %1021 = vmatprep.subr.bf16.mxu0 %v2730_v51  ;;  %v2763_v51 = vld [vmem:[#allocation7 + $0x1bc] ss:$24 sps:$4 sm:$0xff]  }
 0x251   :  { %1022 = vmatpush1.bf16.msra.mxu0 %v2728_v52  ;;  %v2761_v52 = vld [vmem:[#allocation7 + $0x1b8] ss:$24 sps:$4 sm:$0xff]  }
 0x252   :  { %1023 = vmatprep.subr.bf16.mxu0 %v2736_v53  ;;  %v2766_v53 = vld [vmem:[#allocation7 + $0x14] ss:$24 sps:$4 sm:$0xff]  }
 0x255   :  { %1024 = vmatpush1.bf16.msra.mxu0 %v2734_v54  ;;  %v2943_v54 = vmov 1983009808  }
 0x256   :  { %1025 = vmatprep.subr.bf16.mxu0 %v2742_v55  ;;  %v1155_v55 = vunpack.c.l.s4 %v2943_v54 }
 0x259   :  { %1026 = vmatpush1.bf16.msra.mxu0 %v2740_v56  ;;  %v1156_v56 = vunpack.c.0.s8 %v1155_v55 }
 0x25a   :  { %1027 = vmatprep.subr.bf16.mxu0 %v2748_v58  ;;  %v1144_v58 = vld [vmem:[%s3635_s26] sm:$0xff] }
 0x25d   :  { %1028 = vmatpush1.bf16.msra.mxu0 %v2746_v60  ;;  %v1153_v60 = vcombine.high %v1144_v58, %v1144_v58 }
 0x25e   :  { %1029 = vmatprep.subr.bf16.mxu0 %v2754_v45  ;;  %v1354_v45 = vsub.s32 2, %v3179_v57 }
 0x261   :  { %1030 = vmatpush1.bf16.msra.mxu0 %v2752_v46  ;;  %v1332_v46 = vld [vmem:[%s3620_s14] sm:$0x3f]  ;;  %s2944_s14 = smov 91  }
 0x262   :  { %1031 = vmatprep.subr.bf16.mxu0 %v2760_v49 }
 0x265   :  { %1032 = vmatpush1.bf16.msra.mxu0 %v2758_v50 }
 0x266   :  { %1099 = vmatprep.subr.bf16.mxu0 %v2766_v53 }
 0x31e   :  { %v404_v2 = vpop.f32.mrb[0].mxu1 }
 0x31f   :  { %v406_v4 = vpop.f32.mrb[1].mxu1  ;;  %v441_v9 = vadd.f32 %v437_v3, %v404_v2 }
 0x320   :  { %v408_v7 = vpop.f32.mrb[2].mxu1  ;;  %v442_v12 = vadd.f32 %v438_v6, %v406_v4 }
 0x321   :  { %v443_v10 = vadd.f32 %v439_v5, %v408_v7  ;;  %v410_v11 = vpop.f32.mrb[3].mxu1 }
 0x322   :  { %v444_v13 = vadd.f32 %v440_v8, %v410_v11 }
 0x323   :  { %v3190_v14 = vpack.c.bf16 %v443_v10, %v441_v9 }
 0x324   :  { %v446_v15 = vpack.c.bf16 %v444_v13, %v442_v12 }
 0x325   :  { %448 = vrot.lane.b32.xlu0 %v3190_v14, %s2927_s0 }
 0x326   :  { %465 = vrot.lane.b32.xlu1 %v446_v15, %s2927_s0 }
 0x329   :  { %450 = vrot.lane.b32.xlu0 %v3190_v14, %s2929_s1 }
 0x32a   :  { %469 = vrot.lane.b32.xlu1 %v446_v15, %s2929_s1 }
 0x32d   :  { %452 = vrot.lane.b32.xlu0 %v3190_v14, %s2937_s6 }
 0x32e   :  { %473 = vrot.lane.b32.xlu1 %v446_v15, %s2937_s6 }
 0x331   :  { %454 = vrot.lane.b32.xlu0 %v3190_v14, %s2938_s8 }
 0x332   :  { %477 = vrot.lane.b32.xlu1 %v446_v15, %s2938_s8 }
 0x335   :  { %456 = vrot.lane.b32.xlu0 %v3190_v14, %s2933_s25 }
 0x336   :  { %481 = vrot.lane.b32.xlu1 %v446_v15, %s2933_s25  ;;  %s2946_s25 = smov 109  }
 0x339   :  { %485 = vrot.lane.b32.xlu0 %v446_v15, %s2939_s21 }
 0x33a   :  { %487 = vrot.lane.b32.xlu1 %v446_v15, %s2940_s22 }
 0x33d   :  { %489 = vrot.lane.b32.xlu0 %v446_v15, %s2941_s4 }
 0x33e   :  { %491 = vrot.lane.b32.xlu1 %v3190_v14, %s2942_s7 }
 0x341   :  { %493 = vrot.lane.b32.xlu0 %v446_v15, %s2942_s7 }
 0x397   :  { %v3209_v16 = vpop.permute.xlu0 %448 }
 0x398   :  { %v466_v17 = vpop.permute.xlu1 %465 }
 0x399   :  { %497 = vrot.lane.b32.xlu0 %v466_v17, %s2942_s7  ;;  %v468_v18 = vsel %vm467_vm5, %v3209_v16, %v466_v17 }
 0x39a   :  { %495 = vrot.lane.b32.xlu1 %v468_v18, %s2942_s7 }
 0x39b   :  { %v3215_v19 = vpop.permute.xlu0 %450 }
 0x39c   :  { %v470_v20 = vpop.permute.xlu1 %469 }
 0x39d   :  { %501 = vrot.lane.b32.xlu0 %v470_v20, %s2942_s7  ;;  %v472_v21 = vsel %vm471_vm6, %v3215_v19, %v470_v20 }
 0x39e   :  { %499 = vrot.lane.b32.xlu1 %v472_v21, %s2942_s7 }
 0x39f   :  { %v3221_v22 = vpop.permute.xlu0 %452 }
 0x3a0   :  { %v474_v23 = vpop.permute.xlu1 %473 }
 0x3a1   :  { %505 = vrot.lane.b32.xlu0 %v474_v23, %s2942_s7  ;;  %v476_v24 = vsel %vm475_vm7, %v3221_v22, %v474_v23 }
 0x3a2   :  { %503 = vrot.lane.b32.xlu1 %v476_v24, %s2942_s7 }
 0x3a3   :  { %v3226_v25 = vpop.permute.xlu0 %454 }
 0x3a4   :  { %v478_v26 = vpop.permute.xlu1 %477 }
 0x3a5   :  { %509 = vrot.lane.b32.xlu0 %v478_v26, %s2942_s7  ;;  %v480_v27 = vsel %vm479_vm8, %v3226_v25, %v478_v26 }
 0x3a6   :  { %507 = vrot.lane.b32.xlu1 %v480_v27, %s2942_s7  ;;  %v2709_v27 = vld [vmem:[#allocation7 + $0xc] ss:$24 sps:$4 sm:$0xff]  }
 0x3a7   :  { %v3231_v28 = vpop.permute.xlu0 %456 }
 0x3a8   :  { %v482_v29 = vpop.permute.xlu1 %481 }
 0x3a9   :  { %513 = vrot.lane.b32.xlu0 %v482_v29, %s2942_s7  ;;  %v484_v30 = vsel %vm483_vm9, %v3231_v28, %v482_v29 }
 0x3aa   :  { %511 = vrot.lane.b32.xlu1 %v484_v30, %s2942_s7  ;;  %v2707_v30 = vld [vmem:[#allocation7 + $0x8] ss:$24 sps:$4 sm:$0xff]  }
 0x3ab   :  { %v486_v31 = vpop.permute.xlu0 %485 }
 0x3ac   :  { %v488_v33 = vpop.permute.xlu1 %487 }
 0x3ad   :  { %515 = vrot.lane.b32.xlu0 %v486_v31, %s2942_s7  ;;  %v2715_v31 = vld [vmem:[#allocation7 + $0x3c] ss:$24 sps:$4 sm:$0xff]  }
 0x3ae   :  { %458 = vrot.lane.b32.xlu1 %v3190_v14, %s2939_s21 }
 0x3af   :  { %v490_v34 = vpop.permute.xlu0 %489 }
 0x3b0   :  { %v492_v35 = vpop.permute.xlu1 %491 }
 0x3b1   :  { %517 = vrot.lane.b32.xlu0 %v488_v33, %s2942_s7  ;;  %v2721_v33 = vld [vmem:[#allocation7 + $0x6c] ss:$24 sps:$4 sm:$0xff]  }
 0x3b2   :  { %460 = vrot.lane.b32.xlu1 %v3190_v14, %s2940_s22 }
 0x3b3   :  { %v494_v36 = vpop.permute.xlu0 %493 }
 0x3b4   :  { %v522_v37 = vsel %vm521_vm10, %v492_v35, %v494_v36  ;;  %600 = vmatprep.subr.bf16.mxu1 %v494_v36  ;;  %v2727_v35 = vld [vmem:[#allocation7 + $0x9c] ss:$24 sps:$4 sm:$0xff]   ;;  %v2725_v36 = vld [vmem:[#allocation7 + $0x98] ss:$24 sps:$4 sm:$0xff]  }
 0x3b5   :  { %519 = vrot.lane.b32.xlu0 %v490_v34, %s2942_s7  ;;  %v540_v38 = vsel %vm537_vm11, %v3190_v14, %v522_v37  ;;  %v2719_v34 = vld [vmem:[#allocation7 + $0x68] ss:$24 sps:$4 sm:$0xff]   ;;  %v2733_v37 = vld [vmem:[#allocation7 + $0xcc] ss:$24 sps:$4 sm:$0xff]   ;;  %s2945_s7 = smov 90  }
 0x3b6   :  { %462 = vrot.lane.b32.xlu1 %v3190_v14, %s2941_s4  ;;  %601 = vmatpush1.bf16.msra.mxu1 %v540_v38  ;;  %v2731_v38 = vld [vmem:[#allocation7 + $0xc8] ss:$24 sps:$4 sm:$0xff]  }
 0x3b9   :  { %585 = vperm.xlu0 %2674, %v577_v39   ;;  %v2739_v39 = vld [vmem:[#allocation7 + $0xfc] ss:$24 sps:$4 sm:$0xff]  }
 0x3ba   :  { %580 = vperm.xlu1 %2673, %v576_v40   ;;  %v2737_v40 = vld [vmem:[#allocation7 + $0xf8] ss:$24 sps:$4 sm:$0xff]  }
 0x3bd   :  { %1340 = vperm.xlu0 %2674, %v1331_v41   ;;  %v2745_v41 = vld [vmem:[#allocation7 + $0x12c] ss:$24 sps:$4 sm:$0xff]  }
 0x3be   :  { %1335 = vperm.xlu1 %2673, %v1330_v42   ;;  %v2743_v42 = vld [vmem:[#allocation7 + $0x128] ss:$24 sps:$4 sm:$0xff]  }
 0x40b   :  { %v498_v62 = vpop.permute.xlu0 %497 }
 0x40c   :  { %602 = vmatprep.subr.bf16.mxu1 %v498_v62  ;;  %v496_v63 = vpop.permute.xlu1 %495 }
 0x40d   :  { %v523_v0 = vsel %vm521_vm10, %v496_v63, %v498_v62  ;;  %v1159_v62 = vsub.s32 %v1156_v56, %v3179_v57 }
 0x40e   :  { %v544_v2 = vsel %vm537_vm11, %v3209_v16, %v523_v0 }
 0x40f   :  { %v502_v3 = vpop.permute.xlu0 %501  ;;  %603 = vmatpush1.bf16.msra.mxu1 %v544_v2  ;;  %v1167_v63 = vrot.slane %v1153_v60, %v1159_v62  ;;  %v3290_v2 = vrot.slane %v1144_v58, %v1159_v62 }
 0x410   :  { %604 = vmatprep.subr.bf16.mxu1 %v502_v3  ;;  %v500_v4 = vpop.permute.xlu1 %499 }
 0x411   :  { %v524_v5 = vsel %vm521_vm10, %v500_v4, %v502_v3  ;;  %v1169_v0 = vcombine.high %v1167_v63, %v1167_v63 }
 0x412   :  { %v548_v6 = vsel %vm537_vm11, %v3215_v19, %v524_v5 }
 0x413   :  { %v506_v7 = vpop.permute.xlu0 %505  ;;  %605 = vmatpush1.bf16.msra.mxu1 %v548_v6 }
 0x414   :  { %606 = vmatprep.subr.bf16.mxu1 %v506_v7  ;;  %v504_v8 = vpop.permute.xlu1 %503 }
 0x415   :  { %v525_v9 = vsel %vm521_vm10, %v504_v8, %v506_v7 }
 0x416   :  { %v552_v10 = vsel %vm537_vm11, %v3221_v22, %v525_v9 }
 0x417   :  { %v510_v11 = vpop.permute.xlu0 %509  ;;  %607 = vmatpush1.bf16.msra.mxu1 %v552_v10 }
 0x418   :  { %608 = vmatprep.subr.bf16.mxu1 %v510_v11  ;;  %v508_v12 = vpop.permute.xlu1 %507 }
 0x419   :  { %v526_v13 = vsel %vm521_vm10, %v508_v12, %v510_v11 }
 0x41a   :  { %v556_v14 = vsel %vm537_vm11, %v3226_v25, %v526_v13 }
 0x41b   :  { %v514_v15 = vpop.permute.xlu0 %513  ;;  %609 = vmatpush1.bf16.msra.mxu1 %v556_v14 }
 0x41c   :  { %610 = vmatprep.subr.bf16.mxu1 %v514_v15  ;;  %v512_v16 = vpop.permute.xlu1 %511 }
 0x41d   :  { %v527_v17 = vsel %vm521_vm10, %v512_v16, %v514_v15 }
 0x41e   :  { %v560_v18 = vsel %vm537_vm11, %v3231_v28, %v527_v17  ;;  %v2703_v28 = vld [vmem:[%s3615_s9] ss:$8 sps:$4 sm:$0xff]  }
 0x41f   :  { %v516_v19 = vpop.permute.xlu0 %515  ;;  %611 = vmatpush1.bf16.msra.mxu1 %v560_v18 }
 0x420   :  { %612 = vmatprep.subr.bf16.mxu1 %v516_v19  ;;  %v459_v20 = vpop.permute.xlu1 %458 }
 0x421   :  { %v564_v21 = vsel %vm537_vm11, %v459_v20, %v516_v19  ;;  %v2764_v19 = vld [vmem:[#allocation7 + $0x10] ss:$24 sps:$4 sm:$0xff]   ;;  %v2769_v20 = vld [vmem:[#allocation7 + $0x44] ss:$24 sps:$4 sm:$0xff]  }
 0x423   :  { %v518_v22 = vpop.permute.xlu0 %517  ;;  %613 = vmatpush1.bf16.msra.mxu1 %v564_v21  ;;  %v1190_v21 = vsel %vm1182_vm12, %v1167_v63, 0 }
 0x424   :  { %614 = vmatprep.subr.bf16.mxu1 %v518_v22  ;;  %v461_v23 = vpop.permute.xlu1 %460 }
 0x425   :  { %v568_v24 = vsel %vm537_vm11, %v461_v23, %v518_v22  ;;  %v2767_v22 = vld [vmem:[#allocation7 + $0x40] ss:$24 sps:$4 sm:$0xff]   ;;  %v2773_v23 = vld [vmem:[#allocation7 + $0x74] ss:$24 sps:$4 sm:$0xff]  }
 0x427   :  { %v520_v25 = vpop.permute.xlu0 %519  ;;  %615 = vmatpush1.bf16.msra.mxu1 %v568_v24  ;;  %v2771_v24 = vld [vmem:[#allocation7 + $0x70] ss:$24 sps:$4 sm:$0xff]  }
 0x428   :  { %616 = vmatprep.subr.bf16.mxu1 %v520_v25  ;;  %v463_v26 = vpop.permute.xlu1 %462 }
 0x429   :  { %v572_v29 = vsel %vm537_vm11, %v463_v26, %v520_v25  ;;  %v2776_v25 = vld [vmem:[#allocation7 + $0xa4] ss:$24 sps:$4 sm:$0xff]   ;;  %v2777_v26 = vld [vmem:[%s3618_s12] sm:$0xff]  }
 0x42b   :  { %617 = vmatpush1.bf16.msra.mxu1 %v572_v29  ;;  %v2780_v29 = vld [vmem:[#allocation7 + $0xd4] ss:$24 sps:$4 sm:$0xff]  }
 0x42c   :  { %1056 = vmatprep.subr.bf16.mxu1 %v2709_v27  ;;  %v2774_v27 = vld [vmem:[#allocation7 + $0xa0] ss:$24 sps:$4 sm:$0xff]  }
 0x42e   :  { %633 = vmatmul.mubr.bf16.vlgmr.msra.gmra.mrb[4].mxu1 %v2703_v28  ;;  %v2778_v28 = vld [vmem:[#allocation7 + $0xd0] ss:$24 sps:$4 sm:$0xff]  }
 0x42f   :  { %1057 = vmatpush1.bf16.msra.mxu1 %v2707_v30  ;;  %v2783_v30 = vld [vmem:[#allocation7 + $0x104] ss:$24 sps:$4 sm:$0xff]  }
 0x430   :  { %1058 = vmatprep.subr.bf16.mxu1 %v2715_v31  ;;  %v2781_v31 = vld [vmem:[#allocation7 + $0x100] ss:$24 sps:$4 sm:$0xff]  }
 0x433   :  { %1059 = vmatpush1.bf16.msra.mxu1 %v2713_v32  ;;  %v2786_v32 = vld [vmem:[#allocation7 + $0x134] ss:$24 sps:$4 sm:$0xff]  }
 0x434   :  { %1060 = vmatprep.subr.bf16.mxu1 %v2721_v33  ;;  %v2784_v33 = vld [vmem:[#allocation7 + $0x130] ss:$24 sps:$4 sm:$0xff]  }
 0x437   :  { %1061 = vmatpush1.bf16.msra.mxu1 %v2719_v34  ;;  %v2789_v34 = vld [vmem:[#allocation7 + $0x164] ss:$24 sps:$4 sm:$0xff]  }
 0x438   :  { %1062 = vmatprep.subr.bf16.mxu1 %v2727_v35  ;;  %v586_v7 = vpop.permute.xlu0 %585  ;;  %v2787_v35 = vld [vmem:[#allocation7 + $0x160] ss:$24 sps:$4 sm:$0xff]  }
 0x439   :  { %v581_v3 = vpop.permute.xlu1 %580 }
 0x43b   :  { %1063 = vmatpush1.bf16.msra.mxu1 %v2725_v36  ;;  %v2792_v36 = vld [vmem:[#allocation7 + $0x194] ss:$24 sps:$4 sm:$0xff]  }
 0x43c   :  { %1064 = vmatprep.subr.bf16.mxu1 %v2733_v37  ;;  %v2790_v37 = vld [vmem:[#allocation7 + $0x190] ss:$24 sps:$4 sm:$0xff]   ;;  %v3320_v49 = vpop.permute.xlu0 %1340 }
 0x43d   :  { %v1336_v50 = vpop.permute.xlu1 %1335 }
 0x43f   :  { %1065 = vmatpush1.bf16.msra.mxu1 %v2731_v38  ;;  %v2795_v38 = vld [vmem:[#allocation7 + $0x1c4] ss:$24 sps:$4 sm:$0xff]  }
 0x440   :  { %1066 = vmatprep.subr.bf16.mxu1 %v2739_v39  ;;  %v2793_v39 = vld [vmem:[#allocation7 + $0x1c0] ss:$24 sps:$4 sm:$0xff]  }
 0x443   :  { %1067 = vmatpush1.bf16.msra.mxu1 %v2737_v40  ;;  %v1168_v40 = vcombine.high %v3290_v2, %v3290_v2 }
 0x444   :  { %1068 = vmatprep.subr.bf16.mxu1 %v2745_v41  ;;  %v2450_v41 = vld.sshfl [vmem:[%s3635_s26 + $0x8] sm:$0x33 pattern:$0x76325410] }
 0x447   :  { %1069 = vmatpush1.bf16.msra.mxu1 %v2743_v42  ;;  %v1184_v42 = vsel %vm1182_vm12, %v3290_v2, 0 }
 0x448   :  { %1070 = vmatprep.subr.bf16.mxu1 %v2751_v43  ;;  %v1177_v43 = vcombine.high %v2450_v41, %v2450_v41 }
 0x44b   :  { %1071 = vmatpush1.bf16.msra.mxu1 %v2749_v44  ;;  %v1196_v44 = vsel %vm1182_vm12, %v2450_v41, 0 }
 0x44c   :  { %1072 = vmatprep.subr.bf16.mxu1 %v2757_v47  ;;  %v1358_v47 = vsub.s32 3, %v3179_v57 }
 0x44f   :  { %1073 = vmatpush1.bf16.msra.mxu1 %v2755_v48  ;;  %v1355_v48 = vrot.slane %v1332_v46, %v1354_v45 }
 0x450   :  { %1074 = vmatprep.subr.bf16.mxu1 %v2763_v51  ;;  %v1359_v51 = vrot.slane %v1332_v46, %v1358_v47 }
 0x451   :  { %v1376_v53 = vmul.f32 %v1355_v48, %v1336_v50  ;;  %v1382_v55 = vmul.f32 %v1355_v48, %v3320_v49 }
 0x452   :  { %v1377_v56 = vmul.f32 %v1359_v51, %v1336_v50  ;;  %v1383_v60 = vmul.f32 %v1359_v51, %v3320_v49 }
 0x453   :  { %1075 = vmatpush1.bf16.msra.mxu1 %v2761_v52 }
 0x454   :  { %2453 = vmatprep.subr.msk.bf16.mxu1 %vm1182_vm12, %v1169_v0 }
 0x501   :  { %v634_v4 = vpop.f32.mrb[4].mxu1 }
 0x502   :  { %v635_v5 = vadd.f32 %v634_v4, %v581_v3  ;;  %v636_v6 = vpop.f32.mrb[5].mxu1 }
 0x503   :  { %v637_v8 = vadd.f32 %v636_v6, %v581_v3  ;;  %v638_v9 = vpop.f32.mrb[6].mxu1  ;;  %v1347_v6 = vrot.slane %v1332_v46, %v429_v59 }
 0x504   :  { %v639_v10 = vadd.f32 %v638_v9, %v586_v7  ;;  %v640_v11 = vpop.f32.mrb[7].mxu1  ;;  %v643_v13 = vmax.f32 %v635_v5, 0.0  ;;  %v1366_v9 = vsub.s32 5, %v3179_v57 }
 0x505   :  { %v641_v12 = vadd.f32 %v640_v11, %v586_v7  ;;  %v644_v15 = vmax.f32 %v637_v8, 0.0  ;;  %v1351_v7 = vrot.slane %v1332_v46, %v433_v61 }
 0x506   :  { %v645_v14 = vmax.f32 %v639_v10, 0.0  ;;  %v1374_v10 = vmul.f32 %v1347_v6, %v1336_v50 }
 0x507   :  { %v646_v16 = vmax.f32 %v641_v12, 0.0  ;;  %v1380_v12 = vmul.f32 %v1347_v6, %v3320_v49 }
 0x508   :  { %v647_v17 = vpack.c.bf16 %v645_v14, %v643_v13  ;;  %v1362_v13 = vsub.s32 4, %v3179_v57  ;;  %v1375_v14 = vmul.f32 %v1351_v7, %v1336_v50 }
 0x509   :  { %v648_v18 = vpack.c.bf16 %v646_v16, %v644_v15  ;;  %v1381_v15 = vmul.f32 %v1351_v7, %v3320_v49 }
 0x50b   :  { %2446 = vmatprep.mubr.msk.bf16.mxu0 %vm1009_vm13, %v648_v18  ;;  %2447 = vmatprep.mubr.msk.bf16.mxu1 %vm1009_vm13, %v648_v18 }
 0x50c   :  { %1046 = vmatmul.mubr.bf16.vlgmr.msra.gmra.mrb[4].mxu0 %v647_v17  ;;  %1089 = vmatmul.mubr.bf16.vlgmr.msra.gmra.mrb[8].mxu1 %v647_v17 }
 0x50d   :  { %1100 = vmatpush1.bf16.msra.mxu0 %v2764_v19  ;;  %2448 = vmatprep.mubr.msk.bf16.mxu0 %vm1009_vm13, %v648_v18 }
 0x50e   :  { %1101 = vmatprep.subr.bf16.mxu0 %v2769_v20  ;;  %1245 = vmatpush1.bf16.msra.mxu1 %v1190_v21  ;;  %v1367_v20 = vrot.slane %v1332_v46, %v1366_v9 }
 0x50f   :  { %1276 = vmatprep.mubr.bf16.mxu1 %v2931_v1 }
 0x510   :  { %v1379_v57 = vmul.f32 %v1367_v20, %v1336_v50 }
 0x511   :  { %1102 = vmatpush1.bf16.msra.mxu0 %v2767_v22  ;;  %v1363_v22 = vrot.slane %v1332_v46, %v1362_v13 }
 0x512   :  { %1103 = vmatprep.subr.bf16.mxu0 %v2773_v23 }
 0x515   :  { %1104 = vmatpush1.bf16.msra.mxu0 %v2771_v24 }
 0x516   :  { %1105 = vmatprep.subr.bf16.mxu0 %v2776_v25  ;;  %v1378_v25 = vmul.f32 %v1363_v22, %v1336_v50 }
 0x518   :  { %2454 = vmatmul.mubr.msk.bf16.vlgmr.msra.gmra.mrb[8].mxu1 %vm1178_vm14, %v2777_v26 }
 0x519   :  { %1106 = vmatpush1.bf16.msra.mxu0 %v2774_v27  ;;  %v1384_v27 = vmul.f32 %v1363_v22, %v3320_v49 }
 0x51a   :  { %1107 = vmatprep.subr.bf16.mxu0 %v2780_v29 }
 0x51d   :  { %1108 = vmatpush1.bf16.msra.mxu0 %v2778_v28 }
 0x51e   :  { %1109 = vmatprep.subr.bf16.mxu0 %v2783_v30  ;;  %v1385_v30 = vmul.f32 %v1367_v20, %v3320_v49 }
 0x521   :  { %1110 = vmatpush1.bf16.msra.mxu0 %v2781_v31 }
 0x522   :  { %1111 = vmatprep.subr.bf16.mxu0 %v2786_v32 }
 0x525   :  { %1112 = vmatpush1.bf16.msra.mxu0 %v2784_v33 }
 0x526   :  { %1113 = vmatprep.subr.bf16.mxu0 %v2789_v34 }
 0x529   :  { %1114 = vmatpush1.bf16.msra.mxu0 %v2787_v35 }
 0x52a   :  { %1115 = vmatprep.subr.bf16.mxu0 %v2792_v36 }
 0x52d   :  { %1116 = vmatpush1.bf16.msra.mxu0 %v2790_v37  ;;  %v3397_v37 = vld [vmem:[%s3621_s15 + $0x4] ss:$8 sps:$4 sm:$0xff]  }
 0x52e   :  { %1117 = vmatprep.subr.bf16.mxu0 %v2795_v38  ;;  %2459 = vmatprep.mubr.msk.bf16.mxu1 %vm215_vm1, %v3397_v37 }
 0x531   :  { %1118 = vmatpush1.bf16.msra.mxu0 %v2793_v39 }
 0x532   :  { %2451 = vmatprep.subr.msk.bf16.mxu0 %vm1182_vm12, %v1168_v40 }
 0x534   :  { %1132 = vmatmul.mubr.bf16.vlgmr.msra.gmra.mrb[8].mxu0 %v647_v17 }
 0x535   :  { %1202 = vmatpush1.bf16.msra.mxu0 %v1184_v42  ;;  %1233 = vmatprep.mubr.bf16.mxu0 %v2931_v1 }
 0x536   :  { %2455 = vmatprep.subr.msk.bf16.mxu0 %vm1182_vm12, %v1177_v43 }
 0x53c   :  { %2452 = vmatmul.mubr.msk.bf16.vlgmr.msra.gmra.mrb[4].mxu0 %vm1178_vm14, %v2777_v26 }
 0x53d   :  { %1288 = vmatpush1.bf16.msra.mxu0 %v1196_v44  ;;  %1319 = vmatprep.mubr.bf16.mxu0 %v2931_v1 }
 0x544   :  { %2456 = vmatmul.mubr.msk.bf16.vlgmr.msra.gmra.mrb[8].mxu0 %vm1178_vm14, %v2777_v26 }
 0x545   :  { %2460 = vmatprep.mubr.msk.bf16.mxu0 %vm215_vm1, %v3397_v37 }
 0x5eb   :  { %v1278_v52 = vpop.f32.mrb[8].mxu1 }
 0x5ec   :  { %v1280_v54 = vpop.f32.mrb[9].mxu1  ;;  %v1388_v62 = vadd.f32 %v1376_v53, %v1278_v52 }
 0x5ed   :  { %v1282_v58 = vpop.f32.mrb[10].mxu1  ;;  %v1389_v2 = vadd.f32 %v1377_v56, %v1280_v54 }
 0x5ee   :  { %v1394_v63 = vadd.f32 %v1382_v55, %v1282_v58  ;;  %v1284_v0 = vpop.f32.mrb[11].mxu1 }
 0x5ef   :  { %v1395_v3 = vadd.f32 %v1383_v60, %v1284_v0 }
 0x5f0   :  { %v3324_v4 = vpack.c.bf16 %v1394_v63, %v1388_v62 }
 0x5f1   :  { %v3326_v5 = vpack.c.bf16 %v1395_v3, %v1389_v2 }
 0x5f2   :  { %1421 = vrot.lane.b32.xlu0 %v3324_v4, %s2929_s1  ;;  %1411 = vrot.lane.b32.xlu1 %v3324_v4, %s2927_s0 }
 0x5f6   :  { %1475 = vrot.lane.b32.xlu0 %v3324_v4, %s2944_s14  ;;  %1431 = vrot.lane.b32.xlu1 %v3324_v4, %s2936_s19 }
 0x5fa   :  { %1486 = vrot.lane.b32.xlu0 %v3324_v4, %s2945_s7  ;;  %1442 = vrot.lane.b32.xlu1 %v3324_v4, %s2946_s25 }
 0x5fe   :  { %1495 = vrot.lane.b32.xlu0 %v3326_v5, %s2927_s0  ;;  %1453 = vrot.lane.b32.xlu1 %v3324_v4, %s2939_s21 }
 0x602   :  { %1508 = vrot.lane.b32.xlu0 %v3326_v5, %s2936_s19  ;;  %1464 = vrot.lane.b32.xlu1 %v3324_v4, %s2947_s18 }
 0x606   :  { %1517 = vrot.lane.b32.xlu0 %v3326_v5, %s2946_s25  ;;  %1501 = vrot.lane.b32.xlu1 %v3326_v5, %s2929_s1 }
 0x60a   :  { %1526 = vrot.lane.b32.xlu0 %v3326_v5, %s2939_s21  ;;  %1544 = vrot.lane.b32.xlu1 %v3326_v5, %s2944_s14 }
 0x60e   :  { %1535 = vrot.lane.b32.xlu0 %v3326_v5, %s2947_s18  ;;  %1553 = vrot.lane.b32.xlu1 %v3326_v5, %s2945_s7 }
 0x60f   :  { %v1235_v8 = vpop.f32.mrb[4].mxu0 }
 0x610   :  { %v1237_v11 = vpop.f32.mrb[5].mxu0  ;;  %v1386_v61 = vadd.f32 %v1374_v10, %v1235_v8 }
 0x611   :  { %v1239_v59 = vpop.f32.mrb[6].mxu0  ;;  %v1387_v18 = vadd.f32 %v1375_v14, %v1237_v11 }
 0x612   :  { %v1392_v16 = vadd.f32 %v1380_v12, %v1239_v59  ;;  %v1241_v17 = vpop.f32.mrb[7].mxu0 }
 0x613   :  { %v1393_v19 = vadd.f32 %v1381_v15, %v1241_v17 }
 0x614   :  { %v1398_v21 = vpack.c.bf16 %v1392_v16, %v1386_v61 }
 0x615   :  { %v1399_v23 = vpack.c.bf16 %v1393_v19, %v1387_v18 }
 0x616   :  { %1407 = vrot.lane.b32.xlu0 %v1398_v21, %s2927_s0 }
 0x617   :  { %v1321_v24 = vpop.f32.mrb[8].mxu0  ;;  %1409 = vrot.lane.b32.xlu1 %v1399_v23, %s2927_s0  ;;  %1715 = vmatprep.subr.bf16.mxu1 %v1399_v23 }
 0x618   :  { %v1323_v26 = vpop.f32.mrb[9].mxu0  ;;  %1716 = vmatpush1.bf16.msra.mxu1 %v1398_v21  ;;  %v1390_v31 = vadd.f32 %v1378_v25, %v1321_v24 }
 0x619   :  { %v1391_v29 = vadd.f32 %v1379_v57, %v1323_v26  ;;  %v1325_v28 = vpop.f32.mrb[10].mxu0 }
 0x61a   :  { %v1396_v32 = vadd.f32 %v1384_v27, %v1325_v28  ;;  %v1327_v33 = vpop.f32.mrb[11].mxu0  ;;  %1417 = vrot.lane.b32.xlu0 %v1398_v21, %s2929_s1 }
 0x61b   :  { %v1397_v34 = vadd.f32 %v1385_v30, %v1327_v33  ;;  %1419 = vrot.lane.b32.xlu1 %v1399_v23, %s2929_s1 }
 0x61c   :  { %v1402_v35 = vpack.c.bf16 %v1396_v32, %v1390_v31 }
 0x61d   :  { %v1403_v36 = vpack.c.bf16 %v1397_v34, %v1391_v29 }
 0x61e   :  { %1427 = vrot.lane.b32.xlu0 %v1398_v21, %s2936_s19 }
 0x61f   :  { %1429 = vrot.lane.b32.xlu1 %v1399_v23, %s2936_s19 }
 0x622   :  { %1438 = vrot.lane.b32.xlu0 %v1398_v21, %s2946_s25 }
 0x623   :  { %1440 = vrot.lane.b32.xlu1 %v1399_v23, %s2946_s25 }
 0x626   :  { %1503 = vrot.lane.b32.xlu0 %v1402_v35, %s2929_s1 }
 0x627   :  { %1451 = vrot.lane.b32.xlu1 %v1399_v23, %s2939_s21 }
 0x62a   :  { %1546 = vrot.lane.b32.xlu0 %v1402_v35, %s2944_s14 }
 0x62b   :  { %1497 = vrot.lane.b32.xlu1 %v1402_v35, %s2927_s0 }
 0x62e   :  { %1555 = vrot.lane.b32.xlu0 %v1402_v35, %s2945_s7 }
 0x62f   :  { %1510 = vrot.lane.b32.xlu1 %v1402_v35, %s2936_s19 }
 0x632   :  { %1512 = vrot.lane.b32.xlu0 %v1403_v36, %s2936_s19  ;;  %s2948_s19 = smov 74  }
 0x633   :  { %1519 = vrot.lane.b32.xlu1 %v1402_v35, %s2946_s25 }
 0x636   :  { %1521 = vrot.lane.b32.xlu0 %v1403_v36, %s2946_s25 }
 0x637   :  { %1528 = vrot.lane.b32.xlu1 %v1402_v35, %s2939_s21 }
 0x63a   :  { %1530 = vrot.lane.b32.xlu0 %v1403_v36, %s2939_s21 }
 0x63b   :  { %1537 = vrot.lane.b32.xlu1 %v1402_v35, %s2947_s18 }
 0x63e   :  { %1539 = vrot.lane.b32.xlu0 %v1403_v36, %s2947_s18 }
 0x63f   :  { %1462 = vrot.lane.b32.xlu1 %v1399_v23, %s2947_s18 }
 0x642   :  { %1449 = vrot.lane.b32.xlu0 %v1398_v21, %s2939_s21 }
 0x643   :  { %1473 = vrot.lane.b32.xlu1 %v1399_v23, %s2944_s14 }
 0x646   :  { %1460 = vrot.lane.b32.xlu0 %v1398_v21, %s2947_s18 }
 0x647   :  { %1548 = vrot.lane.b32.xlu1 %v1403_v36, %s2944_s14 }
 0x64a   :  { %1471 = vrot.lane.b32.xlu0 %v1398_v21, %s2944_s14 }
 0x64b   :  { %1557 = vrot.lane.b32.xlu1 %v1403_v36, %s2945_s7 }
 0x64e   :  { %1482 = vrot.lane.b32.xlu0 %v1398_v21, %s2945_s7 }
 0x64f   :  { %1484 = vrot.lane.b32.xlu1 %v1399_v23, %s2945_s7 }
 0x652   :  { %1564 = vrot.lane.b32.xlu0 %v3326_v5, %s2948_s19 }
 0x653   :  { %1562 = vrot.lane.b32.xlu1 %v3324_v4, %s2948_s19 }
 0x657   :  { %1566 = vrot.lane.b32.xlu1 %v1402_v35, %s2948_s19 }
 0x664   :  { %v3414_v38 = vpop.permute.xlu0 %1421  ;;  %v3416_v39 = vpop.permute.xlu1 %1411 }
 0x668   :  { %v3418_v40 = vpop.permute.xlu0 %1475  ;;  %v3420_v41 = vpop.permute.xlu1 %1431 }
 0x66c   :  { %v3422_v42 = vpop.permute.xlu0 %1486  ;;  %v3424_v43 = vpop.permute.xlu1 %1442 }
 0x670   :  { %v1496_v44 = vpop.permute.xlu0 %1495  ;;  %v3426_v45 = vpop.permute.xlu1 %1453 }
 0x671   :  { %v1499_v46 = vsel %vm467_vm5, %v3416_v39, %v1496_v44 }
 0x672   :  { %1568 = vrot.lane.b32.xlu0 %v1499_v46, %s2948_s19 }
 0x674   :  { %v1509_v47 = vpop.permute.xlu0 %1508  ;;  %v3431_v48 = vpop.permute.xlu1 %1464 }
 0x675   :  { %v1514_v49 = vsel %vm1433_vm15, %v3420_v41, %v1509_v47 }
 0x676   :  { %1580 = vrot.lane.b32.xlu0 %v1514_v49, %s2948_s19 }
 0x678   :  { %v1518_v50 = vpop.permute.xlu0 %1517  ;;  %v1502_v51 = vpop.permute.xlu1 %1501 }
 0x679   :  { %v1505_v52 = vsel %vm471_vm6, %v3414_v38, %v1502_v51  ;;  %v1523_v54 = vsel %vm1444_vm0, %v3424_v43, %v1518_v50 }
 0x67a   :  { %1574 = vrot.lane.b32.xlu1 %v1505_v52, %s2948_s19 }
 0x67c   :  { %v1527_v53 = vpop.permute.xlu0 %1526  ;;  %v3445_v56 = vpop.permute.xlu1 %1544 }
 0x67d   :  { %v1532_v55 = vsel %vm1455_vm2, %v3426_v45, %v1527_v53 }
 0x67e   :  { %1586 = vrot.lane.b32.xlu1 %v1523_v54, %s2948_s19  ;;  %1592 = vrot.lane.b32.xlu0 %v1532_v55, %s2948_s19 }
 0x680   :  { %v1536_v58 = vpop.permute.xlu0 %1535  ;;  %v3450_v62 = vpop.permute.xlu1 %1553 }
 0x681   :  { %v1541_v60 = vsel %vm1466_vm3, %v3431_v48, %v1536_v58 }
 0x682   :  { %1598 = vrot.lane.b32.xlu1 %v1541_v60, %s2948_s19 }
 0x688   :  { %v1408_v63 = vpop.permute.xlu0 %1407 }
 0x689   :  { %v1410_v0 = vpop.permute.xlu1 %1409 }
 0x68a   :  { %v1413_v2 = vsel %vm467_vm5, %v1408_v63, %v1410_v0  ;;  %v1414_v3 = vsel %vm467_vm5, %v1410_v0, %v3416_v39 }
 0x68b   :  { %1717 = vmatprep.subr.bf16.mxu1 %v1414_v3 }
 0x68c   :  { %v1418_v5 = vpop.permute.xlu0 %1417  ;;  %1718 = vmatpush1.bf16.msra.mxu1 %v1413_v2 }
 0x68d   :  { %v1420_v6 = vpop.permute.xlu1 %1419 }
 0x68e   :  { %v1423_v7 = vsel %vm471_vm6, %v1418_v5, %v1420_v6  ;;  %v1424_v8 = vsel %vm471_vm6, %v1420_v6, %v3414_v38 }
 0x68f   :  { %1719 = vmatprep.subr.bf16.mxu1 %v1424_v8  ;;  %v1691_v8 = vld [vmem:[%s3622_s16] sm:$0xff] }
 0x690   :  { %v1428_v9 = vpop.permute.xlu0 %1427  ;;  %1720 = vmatpush1.bf16.msra.mxu1 %v1423_v7 }
 0x691   :  { %v1430_v10 = vpop.permute.xlu1 %1429 }
 0x692   :  { %v1434_v11 = vsel %vm1433_vm15, %v1428_v9, %v1430_v10  ;;  %v1435_v12 = vsel %vm1433_vm15, %v1430_v10, %v3420_v41  ;;  %v1692_v9 = vld [vmem:[%s3622_s16 + $0x8] sm:$0xff]  ;;  %s2951_s16 = smov [#allocation10]  }
 0x693   :  { %1721 = vmatprep.subr.bf16.mxu1 %v1435_v12  ;;  %v3525_v12 = vld [vmem:[%s3621_s15] ss:$8 sps:$4 sm:$0xff]   ;;  %s2950_s15 = smov 96   ;;  %s2353_s24 = sshll.u32 %s2951_s16, 4  ;;  %s2354_s24 = int_to_ptr.vmem [resolvable:$true] %s2353_s24 }
 0x694   :  { %v1439_v13 = vpop.permute.xlu0 %1438  ;;  %1722 = vmatpush1.bf16.msra.mxu1 %v1434_v11  ;;  %s2887_s17 = scalar_lea.vmem %s2354_s24, 1024  ;;  %p2892_p5 = scmp.lt.s32.totalorder %s2354_s24, %s2354_s24 }
 0x695   :  { %v1441_v14 = vpop.permute.xlu1 %1440  ;;  %p2888_p4 = scmp.ne.s32.totalorder %s2354_s24, %s2887_s17  ;;  %p2893_p6 = scmp.lt.s32.totalorder %s2887_s17, %s2887_s17 }
 0x696   :  { %v1445_v59 = vsel %vm1444_vm0, %v1439_v13, %v1441_v14  ;;  %v1446_v15 = vsel %vm1444_vm0, %v1441_v14, %v3424_v43 }
 0x697   :  { %1723 = vmatprep.subr.bf16.mxu1 %v1446_v15  ;;  %p2894_p7 = por %p2893_p6, %p2892_p5 }
 0x698   :  { %v1504_v61 = vpop.permute.xlu0 %1503  ;;  %1724 = vmatpush1.bf16.msra.mxu1 %v1445_v59 }
 0x699   :  { %v1452_v16 = vpop.permute.xlu1 %1451  ;;  %1578 = vrot.lane.b32.xlu1 %v1504_v61, %s2948_s19  ;;  %v1506_v22 = vsel %vm471_vm6, %v1502_v51, %v1504_v61  ;;  %v1550_v51 = vsel %vm1477_vm4, %v3418_v40, %v3445_v56  ;;  %vm1616_vm6 = vcmask 605184   ;;  %p2895_p8 = pnand %p2894_p7, %p2888_p4 }
 0x69a   :  { %v1457_v17 = vsel %vm1455_vm2, %v1452_v16, %v3426_v45 }
 0x69b   :  { %1725 = vmatprep.subr.bf16.mxu1 %v1457_v17 }
 0x69c   :  { %v1547_v18 = vpop.permute.xlu0 %1546 }
 0x69d   :  { %v1498_v19 = vpop.permute.xlu1 %1497 }
 0x69e   :  { %v1500_v20 = vsel %vm467_vm5, %v1496_v44, %v1498_v19  ;;  %1572 = vrot.lane.b32.xlu0 %v1498_v19, %s2948_s19  ;;  %v1551_v44 = vsel %vm1477_vm4, %v3445_v56, %v1547_v18  ;;  %vm1488_vm5 = vcmask 736256  }
 0x69f   :  { %1570 = vrot.lane.b32.xlu1 %v1500_v20, %s2948_s19  ;;  %v1559_v56 = vsel %vm1488_vm5, %v3422_v42, %v3450_v62 }
 0x6a0   :  { %v1556_v21 = vpop.permute.xlu0 %1555 }
 0x6a1   :  { %v1511_v23 = vpop.permute.xlu1 %1510  ;;  %v1560_v5 = vsel %vm1488_vm5, %v3450_v62, %v1556_v21 }
 0x6a2   :  { %v1515_v24 = vsel %vm1433_vm15, %v1509_v47, %v1511_v23  ;;  %1576 = vrot.lane.b32.xlu0 %v1506_v22, %s2948_s19 }
 0x6a3   :  { %1582 = vrot.lane.b32.xlu1 %v1515_v24, %s2948_s19 }
 0x6a4   :  { %v1513_v57 = vpop.permute.xlu0 %1512 }
 0x6a5   :  { %v1520_v25 = vpop.permute.xlu1 %1519  ;;  %v1516_v28 = vsel %vm1433_vm15, %v1511_v23, %v1513_v57 }
 0x6a6   :  { %v1524_v26 = vsel %vm1444_vm0, %v1518_v50, %v1520_v25 }
 0x6a7   :  { %1588 = vrot.lane.b32.xlu0 %v1524_v26, %s2948_s19 }
 0x6a8   :  { %v1522_v27 = vpop.permute.xlu0 %1521 }
 0x6a9   :  { %v1529_v29 = vpop.permute.xlu1 %1528  ;;  %v1525_v33 = vsel %vm1444_vm0, %v1520_v25, %v1522_v27 }
 0x6aa   :  { %v1533_v30 = vsel %vm1455_vm2, %v1527_v53, %v1529_v29 }
 0x6ab   :  { %1594 = vrot.lane.b32.xlu1 %v1533_v30, %s2948_s19  ;;  %1584 = vrot.lane.b32.xlu0 %v1516_v28, %s2948_s19 }
 0x6ac   :  { %v1531_v31 = vpop.permute.xlu0 %1530 }
 0x6ad   :  { %v1538_v32 = vpop.permute.xlu1 %1537  ;;  %v1534_v46 = vsel %vm1455_vm2, %v1529_v29, %v1531_v31 }
 0x6ae   :  { %v1542_v34 = vsel %vm1466_vm3, %v1536_v58, %v1538_v32 }
 0x6af   :  { %1600 = vrot.lane.b32.xlu0 %v1542_v34, %s2948_s19  ;;  %1590 = vrot.lane.b32.xlu1 %v1525_v33, %s2948_s19 }
 0x6b0   :  { %v1540_v35 = vpop.permute.xlu0 %1539 }
 0x6b1   :  { %v1463_v36 = vpop.permute.xlu1 %1462  ;;  %v1543_v52 = vsel %vm1466_vm3, %v1538_v32, %v1540_v35 }
 0x6b2   :  { %v1468_v53 = vsel %vm1466_vm3, %v1463_v36, %v3431_v48 }
 0x6b3   :  { %1606 = vrot.lane.b32.xlu1 %v1551_v44, %s2948_s19  ;;  %1596 = vrot.lane.b32.xlu0 %v1534_v46, %s2948_s19 }
 0x6b4   :  { %v1450_v47 = vpop.permute.xlu0 %1449 }
 0x6b5   :  { %v1456_v49 = vsel %vm1455_vm2, %v1450_v47, %v1452_v16  ;;  %v1474_v50 = vpop.permute.xlu1 %1473 }
 0x6b6   :  { %1726 = vmatpush1.bf16.msra.mxu1 %v1456_v49  ;;  %v1479_v63 = vsel %vm1477_vm4, %v1474_v50, %v3418_v40 }
 0x6b7   :  { %1604 = vrot.lane.b32.xlu0 %v1550_v51, %s2948_s19  ;;  %1602 = vrot.lane.b32.xlu1 %v1543_v52, %s2948_s19 }
 0x6b8   :  { %1727 = vmatprep.subr.bf16.mxu1 %v1468_v53  ;;  %v1461_v54 = vpop.permute.xlu0 %1460 }
 0x6b9   :  { %v1467_v55 = vsel %vm1466_vm3, %v1461_v54, %v1463_v36  ;;  %v1549_v58 = vpop.permute.xlu1 %1548 }
 0x6ba   :  { %v1552_v60 = vsel %vm1477_vm4, %v1547_v18, %v1549_v58  ;;  %1728 = vmatpush1.bf16.msra.mxu1 %v1467_v55 }
 0x6bb   :  { %1608 = vrot.lane.b32.xlu0 %v1552_v60, %s2948_s19  ;;  %1610 = vrot.lane.b32.xlu1 %v1559_v56, %s2948_s19 }
 0x6bc   :  { %1729 = vmatprep.subr.bf16.mxu1 %v1479_v63  ;;  %v1472_v0 = vpop.permute.xlu0 %1471 }
 0x6bd   :  { %v1478_v2 = vsel %vm1477_vm4, %v1472_v0, %v1474_v50  ;;  %v1558_v3 = vpop.permute.xlu1 %1557  ;;  %v1853_v0 = vld [vmem:[#allocation8 + $0x8] sm:$0xff] }
 0x6be   :  { %v1561_v6 = vsel %vm1488_vm5, %v1556_v21, %v1558_v3  ;;  %1730 = vmatpush1.bf16.msra.mxu1 %v1478_v2  ;;  %v1855_v2 = vld [vmem:[#allocation8 + $0x18] sm:$0xff] }
 0x6bf   :  { %1612 = vrot.lane.b32.xlu0 %v1560_v5, %s2948_s19  ;;  %1614 = vrot.lane.b32.xlu1 %v1561_v6, %s2948_s19  ;;  %v2466_v6 = vpack.c.bf16 %v1855_v2, %v1853_v0  ;;  %v1890_v0 = vld [vmem:[#allocation8 + $0x130] sm:$0xff]  ;;  %v1893_v2 = vld [vmem:[#allocation8 + $0x148] sm:$0xff] }
 0x6c0   :  { %v1483_v7 = vpop.permute.xlu0 %1482 }
 0x6c1   :  { %v1485_v10 = vpop.permute.xlu1 %1484 }
 0x6c2   :  { %v1489_v11 = vsel %vm1488_vm5, %v1483_v7, %v1485_v10  ;;  %v1490_v62 = vsel %vm1488_vm5, %v1485_v10, %v3422_v42  ;;  %v1852_v7 = vld [vmem:[#allocation8] sm:$0xff] }
 0x6c3   :  { %1695 = vperm.xlu0 %2674, %v1691_v8   ;;  %1700 = vperm.xlu1 %2673, %v1692_v9   ;;  %v1854_v8 = vld [vmem:[#allocation8 + $0x10] sm:$0xff] }
 0x6c4   :  { %1731 = vmatprep.subr.bf16.mxu1 %v1490_v62  ;;  %v1565_v13 = vpop.permute.xlu0 %1564  ;;  %v1859_v62 = vld [vmem:[#allocation8 + $0x38] sm:$0xff] }
 0x6c5   :  { %1732 = vmatpush1.bf16.msra.mxu1 %v1489_v11  ;;  %v1563_v14 = vpop.permute.xlu1 %1562  ;;  %v1857_v11 = vld [vmem:[#allocation8 + $0x28] sm:$0xff] }
 0x6c6   :  { %1801 = vmatprep.subr.bf16.mxu1 %v2931_v1  ;;  %v1617_v59 = vsel %vm1616_vm6, %v1563_v14, %v1565_v13  ;;  %v1856_v14 = vld [vmem:[#allocation8 + $0x20] sm:$0xff] }
 0x6c7   :  { %v1655_v16 = vsel %vm1009_vm13, %v3324_v4, %v1617_v59  ;;  %v1858_v59 = vld [vmem:[#allocation8 + $0x30] sm:$0xff] }
 0x6c8   :  { %1748 = vmatmul.mubr.bf16.vlgmr.msra.gmra.mrb[12].mxu1 %v3525_v12 }
 0x6c9   :  { %v1567_v15 = vpop.permute.xlu1 %1566  ;;  %2461 = vmatprep.mubr.msk.bf16.mxu1 %vm215_vm1, %v3397_v37  ;;  %vm2176_vm1 = vcmask 785408  }
 0x6ca   :  { %1802 = vmatpush1.bf16.msra.mxu1 %v1567_v15  ;;  %v1618_v61 = vsel %vm1616_vm6, %v1565_v13, %v1567_v15  ;;  %v1861_v15 = vld [vmem:[#allocation8 + $0x48] sm:$0xff] }
 0x6cb   :  { %1758 = vmatprep.subr.bf16.mxu0 %v1618_v61  ;;  %1803 = vmatprep.subr.bf16.mxu1 %v2931_v1  ;;  %v1863_v61 = vld [vmem:[#allocation8 + $0x58] sm:$0xff] }
 0x6cc   :  { %1759 = vmatpush1.bf16.msra.mxu0 %v1655_v16  ;;  %v2472_v16 = vpack.c.bf16 %v1858_v59, %v1856_v14 }
 0x6e4   :  { %v1569_v18 = vpop.permute.xlu0 %1568 }
 0x6e8   :  { %v1581_v20 = vpop.permute.xlu0 %1580 }
 0x6ec   :  { %v1575_v17 = vpop.permute.xlu1 %1574 }
 0x6f0   :  { %v1587_v19 = vpop.permute.xlu1 %1586  ;;  %v1593_v22 = vpop.permute.xlu0 %1592 }
 0x6f4   :  { %v1599_v21 = vpop.permute.xlu1 %1598 }
 0x70b   :  { %v1579_v23 = vpop.permute.xlu1 %1578 }
 0x710   :  { %v1573_v24 = vpop.permute.xlu0 %1572 }
 0x711   :  { %v1571_v57 = vpop.permute.xlu1 %1570  ;;  %1804 = vmatpush1.bf16.msra.mxu1 %v1573_v24 }
 0x712   :  { %v1619_v37 = vsel %vm1616_vm6, %v1569_v18, %v1571_v57  ;;  %v1620_v25 = vsel %vm1616_vm6, %v1571_v57, %v1573_v24  ;;  %1805 = vmatprep.subr.bf16.mxu1 %v2931_v1  ;;  %v1862_v18 = vld [vmem:[#allocation8 + $0x50] sm:$0xff]  ;;  %v1869_v57 = vld [vmem:[#allocation8 + $0x88] sm:$0xff] }
 0x713   :  { %1760 = vmatprep.subr.bf16.mxu0 %v1620_v25  ;;  %v1659_v4 = vsel %vm1009_vm13, %v3416_v39, %v1619_v37  ;;  %v1866_v24 = vld [vmem:[#allocation8 + $0x70] sm:$0xff]  ;;  %v1871_v37 = vld [vmem:[#allocation8 + $0x98] sm:$0xff] }
 0x714   :  { %1761 = vmatpush1.bf16.msra.mxu0 %v1659_v4  ;;  %v1577_v26 = vpop.permute.xlu0 %1576  ;;  %v2482_v25 = vpack.c.bf16 %v1871_v37, %v1869_v57  ;;  %v1868_v4 = vld [vmem:[#allocation8 + $0x80] sm:$0xff]  ;;  %v1910_v37 = vld [vmem:[#allocation8 + $0x1d0] sm:$0xff] }
 0x715   :  { %v1621_v27 = vsel %vm1616_vm6, %v1575_v17, %v1577_v26  ;;  %1806 = vmatpush1.bf16.msra.mxu1 %v1579_v23  ;;  %v1622_v29 = vsel %vm1616_vm6, %v1577_v26, %v1579_v23  ;;  %v1583_v30 = vpop.permute.xlu1 %1582  ;;  %v2474_v17 = vpack.c.bf16 %v1863_v61, %v1861_v15  ;;  %v1864_v23 = vld [vmem:[#allocation8 + $0x60] sm:$0xff]  ;;  %v1870_v26 = vld [vmem:[#allocation8 + $0x90] sm:$0xff] }
 0x716   :  { %1762 = vmatprep.subr.bf16.mxu0 %v1622_v29  ;;  %v1663_v28 = vsel %vm1009_vm13, %v3414_v38, %v1621_v27  ;;  %1807 = vmatprep.subr.bf16.mxu1 %v2931_v1  ;;  %v1623_v32 = vsel %vm1616_vm6, %v1581_v20, %v1583_v30  ;;  %v1867_v20 = vld [vmem:[#allocation8 + $0x78] sm:$0xff]  ;;  %v1873_v27 = vld [vmem:[#allocation8 + $0xa8] sm:$0xff]  ;;  %v1900_v15 = vld [vmem:[#allocation8 + $0x180] sm:$0xff] }
 0x717   :  { %v1667_v35 = vsel %vm1009_vm13, %v3420_v41, %v1623_v32  ;;  %v1875_v29 = vld [vmem:[#allocation8 + $0xb8] sm:$0xff]  ;;  %v1874_v32 = vld [vmem:[#allocation8 + $0xb0] sm:$0xff]  ;;  %v1908_v57 = vld [vmem:[#allocation8 + $0x1c0] sm:$0xff] }
 0x718   :  { %1763 = vmatpush1.bf16.msra.mxu0 %v1663_v28  ;;  %v2484_v28 = vpack.c.bf16 %v1870_v26, %v1868_v4  ;;  %v1902_v61 = vld [vmem:[#allocation8 + $0x190] sm:$0xff]  ;;  %v2524_v4 = vpack.c.bf16 %v1910_v37, %v1908_v57 }
 0x719   :  { %v1589_v31 = vpop.permute.xlu0 %1588 }
 0x71a   :  { %v1625_v38 = vsel %vm1616_vm6, %v1587_v19, %v1589_v31  ;;  %v1865_v19 = vld [vmem:[#allocation8 + $0x68] sm:$0xff] }
 0x71b   :  { %v1671_v47 = vsel %vm1009_vm13, %v3424_v43, %v1625_v38  ;;  %v1876_v38 = vld [vmem:[#allocation8 + $0xc0] sm:$0xff] }
 0x71d   :  { %v1595_v33 = vpop.permute.xlu1 %1594  ;;  %v1585_v39 = vpop.permute.xlu0 %1584 }
 0x71e   :  { %1808 = vmatpush1.bf16.msra.mxu1 %v1585_v39  ;;  %v1624_v34 = vsel %vm1616_vm6, %v1583_v30, %v1585_v39  ;;  %v1627_v49 = vsel %vm1616_vm6, %v1593_v22, %v1595_v33  ;;  %v2478_v22 = vpack.c.bf16 %v1867_v20, %v1865_v19  ;;  %v2486_v30 = vpack.c.bf16 %v1875_v29, %v1873_v27  ;;  %v1879_v39 = vld [vmem:[#allocation8 + $0xd8] sm:$0xff]  ;;  %v1904_v19 = vld [vmem:[#allocation8 + $0x1a0] sm:$0xff]  ;;  %v1906_v20 = vld [vmem:[#allocation8 + $0x1b0] sm:$0xff] }
 0x71f   :  { %1764 = vmatprep.subr.bf16.mxu0 %v1624_v34  ;;  %1809 = vmatprep.subr.bf16.mxu1 %v2931_v1  ;;  %v1675_v52 = vsel %vm1009_vm13, %v3426_v45, %v1627_v49  ;;  %v1912_v27 = vld [vmem:[#allocation8 + $0x1e0] sm:$0xff]  ;;  %v1914_v29 = vld [vmem:[#allocation8 + $0x1f0] sm:$0xff] }
 0x720   :  { %1765 = vmatpush1.bf16.msra.mxu0 %v1667_v35 }
 0x721   :  { %v1591_v36 = vpop.permute.xlu1 %1590  ;;  %v1601_v44 = vpop.permute.xlu0 %1600 }
 0x722   :  { %1810 = vmatpush1.bf16.msra.mxu1 %v1591_v36  ;;  %v1626_v46 = vsel %vm1616_vm6, %v1589_v31, %v1591_v36  ;;  %v1629_v53 = vsel %vm1616_vm6, %v1599_v21, %v1601_v44  ;;  %v1872_v31 = vld [vmem:[#allocation8 + $0xa0] sm:$0xff]  ;;  %v1878_v36 = vld [vmem:[#allocation8 + $0xd0] sm:$0xff] }
 0x723   :  { %1766 = vmatprep.subr.bf16.mxu0 %v1626_v46  ;;  %1811 = vmatprep.subr.bf16.mxu1 %v2931_v1  ;;  %v1679_v58 = vsel %vm1009_vm13, %v3431_v48, %v1629_v53  ;;  %v2488_v34 = vpack.c.bf16 %v1874_v32, %v1872_v31  ;;  %v1883_v46 = vld [vmem:[#allocation8 + $0xf8] sm:$0xff]  ;;  %v2528_v31 = vpack.c.bf16 %v1914_v29, %v1912_v27 }
 0x724   :  { %1767 = vmatpush1.bf16.msra.mxu0 %v1671_v47  ;;  %v2492_v47 = vpack.c.bf16 %v1878_v36, %v1876_v38  ;;  %v1916_v38 = vld [vmem:[#allocation8 + $0x200] sm:$0xff]  ;;  %v1918_v36 = vld [vmem:[#allocation8 + $0x210] sm:$0xff] }
 0x725   :  { %v1607_v41 = vpop.permute.xlu1 %1606  ;;  %v1597_v50 = vpop.permute.xlu0 %1596 }
 0x726   :  { %1812 = vmatpush1.bf16.msra.mxu1 %v1597_v50  ;;  %v1628_v51 = vsel %vm1616_vm6, %v1595_v33, %v1597_v50  ;;  %v1877_v33 = vld [vmem:[#allocation8 + $0xc8] sm:$0xff]  ;;  %v1882_v50 = vld [vmem:[#allocation8 + $0xf0] sm:$0xff] }
 0x727   :  { %1768 = vmatprep.subr.bf16.mxu0 %v1628_v51  ;;  %1813 = vmatprep.subr.bf16.mxu1 %v2931_v1  ;;  %v2490_v35 = vpack.c.bf16 %v1879_v39, %v1877_v33  ;;  %v1885_v51 = vld [vmem:[#allocation8 + $0x108] sm:$0xff] }
 0x728   :  { %1769 = vmatpush1.bf16.msra.mxu0 %v1675_v52  ;;  %v1887_v52 = vld [vmem:[#allocation8 + $0x118] sm:$0xff] }
 0x729   :  { %v1603_v43 = vpop.permute.xlu1 %1602  ;;  %v1605_v54 = vpop.permute.xlu0 %1604 }
 0x72a   :  { %1814 = vmatpush1.bf16.msra.mxu1 %v1603_v43  ;;  %v1630_v55 = vsel %vm1616_vm6, %v1601_v44, %v1603_v43  ;;  %v1631_v56 = vsel %vm1616_vm6, %v1605_v54, %v1607_v41  ;;  %v1881_v44 = vld [vmem:[#allocation8 + $0xe8] sm:$0xff]  ;;  %v2498_v43 = vpack.c.bf16 %v1887_v52, %v1885_v51  ;;  %v1884_v54 = vld [vmem:[#allocation8 + $0x100] sm:$0xff] }
 0x72b   :  { %1770 = vmatprep.subr.bf16.mxu0 %v1630_v55  ;;  %1815 = vmatprep.subr.bf16.mxu1 %v2931_v1  ;;  %v1683_v3 = vsel %vm1009_vm13, %v3418_v40, %v1631_v56  ;;  %v2470_v40 = vpack.c.bf16 %v1859_v62, %v1857_v11  ;;  %v2494_v49 = vpack.c.bf16 %v1883_v46, %v1881_v44  ;;  %v1886_v55 = vld [vmem:[#allocation8 + $0x110] sm:$0xff]  ;;  %v1891_v56 = vld [vmem:[#allocation8 + $0x138] sm:$0xff]  ;;  %v1896_v62 = vld [vmem:[#allocation8 + $0x160] sm:$0xff] }
 0x72c   :  { %1771 = vmatpush1.bf16.msra.mxu0 %v1679_v58  ;;  %v1889_v58 = vld [vmem:[#allocation8 + $0x128] sm:$0xff] }
 0x72d   :  { %v1611_v45 = vpop.permute.xlu1 %1610  ;;  %v1609_v60 = vpop.permute.xlu0 %1608 }
 0x72e   :  { %1816 = vmatpush1.bf16.msra.mxu1 %v1609_v60  ;;  %v1632_v63 = vsel %vm1616_vm6, %v1607_v41, %v1609_v60  ;;  %v1880_v41 = vld [vmem:[#allocation8 + $0xe0] sm:$0xff]  ;;  %v2502_v60 = vpack.c.bf16 %v1891_v56, %v1889_v58  ;;  %v1922_v56 = vld [vmem:[#allocation8 + $0x230] sm:$0xff] }
 0x72f   :  { %1772 = vmatprep.subr.bf16.mxu0 %v1632_v63  ;;  %1817 = vmatprep.subr.bf16.mxu1 %v2931_v1  ;;  %v2468_v1 = vpack.c.bf16 %v1854_v8, %v1852_v7  ;;  %v2496_v53 = vpack.c.bf16 %v1882_v50, %v1880_v41  ;;  %v1888_v63 = vld [vmem:[#allocation8 + $0x120] sm:$0xff]  ;;  %v1894_v7 = vld [vmem:[#allocation8 + $0x150] sm:$0xff]  ;;  %v1897_v8 = vld [vmem:[#allocation8 + $0x168] sm:$0xff] }
 0x730   :  { %1773 = vmatpush1.bf16.msra.mxu0 %v1683_v3  ;;  %v1895_v3 = vld [vmem:[#allocation8 + $0x158] sm:$0xff]  ;;  %v1920_v58 = vld [vmem:[#allocation8 + $0x220] sm:$0xff] }
 0x731   :  { %v1615_v48 = vpop.permute.xlu1 %1614  ;;  %v1613_v5 = vpop.permute.xlu0 %1612 }
 0x732   :  { %v1633_v9 = vsel %vm1616_vm6, %v1611_v45, %v1613_v5  ;;  %1818 = vmatpush1.bf16.msra.mxu1 %v1615_v48  ;;  %v1634_v10 = vsel %vm1616_vm6, %v1613_v5, %v1615_v48  ;;  %v2500_v45 = vpack.c.bf16 %v1886_v55, %v1884_v54  ;;  %v2504_v48 = vpack.c.bf16 %v1890_v0, %v1888_v63 }
 0x733   :  { %1774 = vmatprep.subr.bf16.mxu0 %v1634_v10  ;;  %v1687_v13 = vsel %vm1009_vm13, %v3422_v42, %v1633_v9  ;;  %2539 = vmatprep.subr.bf16.mxu1 %v2466_v6  ;;  %v1860_v42 = vld [vmem:[#allocation8 + $0x40] sm:$0xff]  ;;  %v2506_v5 = vpack.c.bf16 %v1895_v3, %v1893_v2  ;;  %v1899_v9 = vld [vmem:[#allocation8 + $0x178] sm:$0xff]  ;;  %v2949_v0 = vmov 0.0  }
 0x734   :  { %1775 = vmatpush1.bf16.msra.mxu0 %v1687_v13  ;;  %v2476_v21 = vpack.c.bf16 %v1862_v18, %v1860_v42  ;;  %v2510_v11 = vpack.c.bf16 %v1899_v9, %v1897_v8  ;;  %v1898_v13 = vld [vmem:[#allocation8 + $0x170] sm:$0xff]  ;;  %v2516_v42 = vpack.c.bf16 %v1902_v61, %v1900_v15 }
 0x735   :  { %1834 = vmatmul.mubr.bf16.vlgmr.msra.gmra.mrb[16].mxu1 %v3525_v12  ;;  %2467 = vmatprep.subr.bf16.mxu0 %v2466_v6  ;;  %v1892_v6 = vld [vmem:[#allocation8 + $0x140] sm:$0xff]  ;;  %v2512_v14 = vpack.c.bf16 %v1898_v13, %v1896_v62 }
 0x736   :  { %2541 = vmatpush1.bf16.msra.mxu1 %v2468_v1  ;;  %v2508_v10 = vpack.c.bf16 %v1894_v7, %v1892_v6 }
 0x737   :  { %1791 = vmatmul.mubr.bf16.vlgmr.msra.gmra.mrb[12].mxu0 %v3525_v12  ;;  %2543 = vmatprep.subr.bf16.mxu1 %v2470_v40  ;;  %v2480_v12 = vpack.c.bf16 %v1866_v24, %v1864_v23  ;;  %v2520_v23 = vpack.c.bf16 %v1906_v20, %v1904_v19 }
 0x738   :  { %2469 = vmatpush1.bf16.msra.mxu0 %v2468_v1  ;;  %v1901_v1 = vld [vmem:[#allocation8 + $0x188] sm:$0xff] }
 0x739   :  { %2471 = vmatprep.subr.bf16.mxu0 %v2470_v40  ;;  %v1903_v40 = vld [vmem:[#allocation8 + $0x198] sm:$0xff] }
 0x73a   :  { %2545 = vmatpush1.bf16.msra.mxu1 %v2472_v16  ;;  %v2514_v59 = vpack.c.bf16 %v1903_v40, %v1901_v1 }
 0x73b   :  { %2547 = vmatprep.subr.bf16.mxu1 %v2474_v17 }
 0x73c   :  { %2473 = vmatpush1.bf16.msra.mxu0 %v2472_v16  ;;  %v1905_v16 = vld [vmem:[#allocation8 + $0x1a8] sm:$0xff] }
 0x73d   :  { %2475 = vmatprep.subr.bf16.mxu0 %v2474_v17  ;;  %v1907_v17 = vld [vmem:[#allocation8 + $0x1b8] sm:$0xff] }
 0x73e   :  { %2549 = vmatpush1.bf16.msra.mxu1 %v2476_v21  ;;  %v2518_v18 = vpack.c.bf16 %v1907_v17, %v1905_v16 }
 0x73f   :  { %2551 = vmatprep.subr.bf16.mxu1 %v2478_v22 }
 0x740   :  { %2477 = vmatpush1.bf16.msra.mxu0 %v2476_v21  ;;  %v1909_v21 = vld [vmem:[#allocation8 + $0x1c8] sm:$0xff] }
 0x741   :  { %2479 = vmatprep.subr.bf16.mxu0 %v2478_v22  ;;  %v1911_v22 = vld [vmem:[#allocation8 + $0x1d8] sm:$0xff] }
 0x742   :  { %2553 = vmatpush1.bf16.msra.mxu1 %v2480_v12  ;;  %v2522_v24 = vpack.c.bf16 %v1911_v22, %v1909_v21  ;;  %v1696_v33 = vpop.permute.xlu0 %1695  ;;  %v1701_v41 = vpop.permute.xlu1 %1700 }
 0x743   :  { %2555 = vmatprep.subr.bf16.mxu1 %v2482_v25 }
 0x744   :  { %2481 = vmatpush1.bf16.msra.mxu0 %v2480_v12  ;;  %v1913_v12 = vld [vmem:[#allocation8 + $0x1e8] sm:$0xff] }
 0x745   :  { %2483 = vmatprep.subr.bf16.mxu0 %v2482_v25  ;;  %v1915_v25 = vld [vmem:[#allocation8 + $0x1f8] sm:$0xff] }
 0x746   :  { %2557 = vmatpush1.bf16.msra.mxu1 %v2484_v28  ;;  %v2526_v26 = vpack.c.bf16 %v1915_v25, %v1913_v12 }
 0x747   :  { %2559 = vmatprep.subr.bf16.mxu1 %v2486_v30 }
 0x748   :  { %2485 = vmatpush1.bf16.msra.mxu0 %v2484_v28  ;;  %v1917_v28 = vld [vmem:[#allocation8 + $0x208] sm:$0xff] }
 0x749   :  { %2487 = vmatprep.subr.bf16.mxu0 %v2486_v30  ;;  %v1919_v30 = vld [vmem:[#allocation8 + $0x218] sm:$0xff] }
 0x74a   :  { %2561 = vmatpush1.bf16.msra.mxu1 %v2488_v34  ;;  %v2530_v32 = vpack.c.bf16 %v1919_v30, %v1917_v28 }
 0x74b   :  { %2563 = vmatprep.subr.bf16.mxu1 %v2490_v35 }
 0x74c   :  { %2489 = vmatpush1.bf16.msra.mxu0 %v2488_v34 }
 0x74d   :  { %2491 = vmatprep.subr.bf16.mxu0 %v2490_v35 }
 0x74e   :  { %2565 = vmatpush1.bf16.msra.mxu1 %v2492_v47 }
 0x74f   :  { %2567 = vmatprep.subr.bf16.mxu1 %v2494_v49 }
 0x750   :  { %2493 = vmatpush1.bf16.msra.mxu0 %v2492_v47  ;;  %v1921_v47 = vld [vmem:[#allocation8 + $0x228] sm:$0xff] }
 0x751   :  { %2495 = vmatprep.subr.bf16.mxu0 %v2494_v49  ;;  %v1923_v49 = vld [vmem:[#allocation8 + $0x238] sm:$0xff] }
 0x752   :  { %2569 = vmatpush1.bf16.msra.mxu1 %v2496_v53  ;;  %v3579_v55 = vpack.c.bf16 %v1923_v49, %v1921_v47 }
 0x753   :  { %2571 = vmatprep.subr.bf16.mxu1 %v2498_v43 }
 0x754   :  { %2497 = vmatpush1.bf16.msra.mxu0 %v2496_v53  ;;  %v3577_v53 = vpack.c.bf16 %v1918_v36, %v1916_v38 }
 0x755   :  { %2499 = vmatprep.subr.bf16.mxu0 %v2498_v43 }
 0x756   :  { %2573 = vmatpush1.bf16.msra.mxu1 %v2500_v45 }
 0x757   :  { %2575 = vmatprep.subr.bf16.mxu1 %v2502_v60 }
 0x758   :  { %2501 = vmatpush1.bf16.msra.mxu0 %v2500_v45 }
 0x759   :  { %2503 = vmatprep.subr.bf16.mxu0 %v2502_v60  ;;  %v2536_v60 = vpack.c.bf16 %v1922_v56, %v1920_v58 }
 0x75a   :  { %2577 = vmatpush1.bf16.msra.mxu1 %v2504_v48 }
 0x75b   :  { %2579 = vmatprep.subr.bf16.mxu1 %v2506_v5 }
 0x75c   :  { %2505 = vmatpush1.bf16.msra.mxu0 %v2504_v48 }
 0x75d   :  { %2507 = vmatprep.subr.bf16.mxu0 %v2506_v5 }
 0x75e   :  { %2581 = vmatpush1.bf16.msra.mxu1 %v2508_v10 }
 0x75f   :  { %2583 = vmatprep.subr.bf16.mxu1 %v2510_v11 }
 0x760   :  { %2509 = vmatpush1.bf16.msra.mxu0 %v2508_v10 }
 0x761   :  { %2511 = vmatprep.subr.bf16.mxu0 %v2510_v11 }
 0x762   :  { %2585 = vmatpush1.bf16.msra.mxu1 %v2512_v14 }
 0x763   :  { %2587 = vmatprep.subr.bf16.mxu1 %v2514_v59 }
 0x764   :  { %2513 = vmatpush1.bf16.msra.mxu0 %v2512_v14 }
 0x765   :  { %2515 = vmatprep.subr.bf16.mxu0 %v2514_v59 }
 0x766   :  { %2589 = vmatpush1.bf16.msra.mxu1 %v2516_v42 }
 0x767   :  { %2591 = vmatprep.subr.bf16.mxu1 %v2518_v18 }
 0x768   :  { %2517 = vmatpush1.bf16.msra.mxu0 %v2516_v42 }
 0x769   :  { %2519 = vmatprep.subr.bf16.mxu0 %v2518_v18 }
 0x76a   :  { %2593 = vmatpush1.bf16.msra.mxu1 %v2520_v23 }
 0x76b   :  { %2595 = vmatprep.subr.bf16.mxu1 %v2522_v24 }
 0x76c   :  { %2521 = vmatpush1.bf16.msra.mxu0 %v2520_v23 }
 0x76d   :  { %2523 = vmatprep.subr.bf16.mxu0 %v2522_v24 }
 0x76e   :  { %2597 = vmatpush1.bf16.msra.mxu1 %v2524_v4 }
 0x76f   :  { %2599 = vmatprep.subr.bf16.mxu1 %v2526_v26 }
 0x770   :  { %2525 = vmatpush1.bf16.msra.mxu0 %v2524_v4 }
 0x771   :  { %2527 = vmatprep.subr.bf16.mxu0 %v2526_v26 }
 0x772   :  { %2601 = vmatpush1.bf16.msra.mxu1 %v2528_v31 }
 0x773   :  { %2610 = vmatprep.subr.bf16.mxu1 %v2530_v32 }
 0x774   :  { %2529 = vmatpush1.bf16.msra.mxu0 %v2528_v31 }
 0x775   :  { %2531 = vmatprep.subr.bf16.mxu0 %v2530_v32 }
 0x79b   :  { %v1749_v39 = vpop.f32.mrb[12].mxu1 }
 0x79c   :  { %v1750_v34 = vadd.f32 %v1749_v39, %v1696_v33  ;;  %v1751_v35 = vpop.f32.mrb[13].mxu1 }
 0x79d   :  { %v1752_v44 = vadd.f32 %v1751_v35, %v1696_v33  ;;  %v1753_v46 = vpop.f32.mrb[14].mxu1 }
 0x79e   :  { %v1755_v50 = vpop.f32.mrb[15].mxu1  ;;  %v1842_v43 = vmax.f32 %v1750_v34, 0.0  ;;  %v1754_v54 = vadd.f32 %v1753_v46, %v1701_v41 }
 0x79f   :  { %v1843_v51 = vmax.f32 %v1752_v44, 0.0  ;;  %v1756_v52 = vadd.f32 %v1755_v50, %v1701_v41 }
 0x7a0   :  { %v1847_v63 = vmax.f32 %v1754_v54, 0.0 }
 0x7a1   :  { %v1848_v45 = vmax.f32 %v1756_v52, 0.0  ;;  %1994 = vmatprep.mubr.f32.mxu0 %v1843_v51 }
 0x7a2   :  { %1995 = vmatmul.mubr.f32.vlgmr.msra.gmra.mrb[16].mxu0 %v1842_v43 }
 0x7a3   :  { %2000 = vmatprep.mubr.f32.mxu0 %v1848_v45  ;;  %2533 = vmatpush1.bf16.msra.mxu0 %v3577_v53 }
 0x7a4   :  { %2535 = vmatprep.subr.bf16.mxu0 %v3579_v55 }
 0x7a6   :  { %2001 = vmatmul.mubr.f32.gmra.mrb[18].mxu0 %v1847_v63 }
 0x7a7   :  { %2537 = vmatpush1.bf16.msra.mxu0 %v2536_v60  ;;  %2071 = vmatprep.mubr.f32.mxu0 %v2949_v0 }
 0x7a8   :  { %2603 = vmatprep.subr.bf16.mxu0 %v2530_v32 }
 0x808   :  { %v1835_v2 = vpop.f32.mrb[16].mxu1 }
 0x809   :  { %v1836_v3 = vadd.f32 %v1835_v2, %v1696_v33  ;;  %v1837_v48 = vpop.f32.mrb[17].mxu1 }
 0x80a   :  { %v1792_v5 = vpop.f32.mrb[12].mxu0  ;;  %v1838_v6 = vpop.f32.mrb[18].mxu1 }
 0x80b   :  { %v1846_v7 = vmax.f32 %v1836_v3, 0.0  ;;  %v1793_v8 = vadd.f32 %v1792_v5, %v1696_v33  ;;  %v1839_v9 = vadd.f32 %v1838_v6, %v1701_v41  ;;  %v1794_v10 = vpop.f32.mrb[13].mxu0  ;;  %v1840_v11 = vpop.f32.mrb[19].mxu1 }
 0x80c   :  { %v1795_v62 = vadd.f32 %v1794_v10, %v1696_v33  ;;  %v1796_v13 = vpop.f32.mrb[14].mxu0 }
 0x80d   :  { %v1844_v1 = vmax.f32 %v1793_v8, 0.0  ;;  %v1797_v40 = vadd.f32 %v1796_v13, %v1701_v41  ;;  %v1798_v14 = vpop.f32.mrb[15].mxu0  ;;  %2168 = vrot.lane.b32.xlu1 %v1846_v7, %s2950_s15  ;;  %v1851_v61 = vmax.f32 %v1839_v9, 0.0 }
 0x80e   :  { %v1845_v59 = vmax.f32 %v1795_v62, 0.0  ;;  %v1799_v15 = vadd.f32 %v1798_v14, %v1701_v41 }
 0x80f   :  { %v1849_v16 = vmax.f32 %v1797_v40, 0.0  ;;  %2462 = vmatmul.mubr.msk.f32.vlgmr.msra.gmra.mrb[16].mxu0 %vm1009_vm13, %v1844_v1 }
 0x810   :  { %v2675_v17 = vpack.i.bf16 %v1844_v1, %v1845_v59  ;;  %v1850_v42 = vmax.f32 %v1799_v15, 0.0  ;;  %2077 = vmatprep.mubr.f32.mxu0 %v2949_v0  ;;  %2605 = vmatpush1.bf16.msra.mxu0 %v3577_v53 }
 0x811   :  { %2174 = vrot.lane.b32.xlu1 %v1851_v61, %s2950_s15  ;;  %2607 = vmatprep.subr.bf16.mxu0 %v3579_v55 }
 0x812   :  { %v2680_v18 = vpack.i.bf16 %v1849_v16, %v1850_v42  ;;  %2676 = vrot.lane.b32.xlu0 %v2675_v17, %s2950_s15 }
 0x813   :  { %2463 = vmatmul.mubr.msk.f32.gmra.mrb[18].mxu0 %vm1009_vm13, %v1849_v16 }
 0x814   :  { %2609 = vmatpush1.bf16.msra.mxu0 %v2536_v60  ;;  %2330 = vmatprep.mubr.f32.mxu0 %v2949_v0 }
 0x816   :  { %2681 = vrot.lane.b32.xlu0 %v2680_v18, %s2950_s15 }
 0x87f   :  { %v2169_v19 = vpop.permute.xlu1 %2168 }
 0x880   :  { %2464 = vmatmul.mubr.msk.f32.vlgmr.msra.gmra.mrb[20].mxu0 %vm1009_vm13, %v2169_v19 }
 0x883   :  { %v2175_v25 = vpop.permute.xlu1 %2174 }
 0x884   :  { %v2677_v20 = vpop.permute.xlu0 %2676 }
 0x885   :  { %v2679_v21 = vunpack.i.h.bf16 %v2677_v20  ;;  %v2678_v22 = vunpack.i.l.bf16 %v2677_v20 }
 0x887   :  { %v2178_v23 = vsel %vm2176_vm1, %v2678_v22, %v2169_v19  ;;  %v2177_v24 = vsel %vm2176_vm1, %v2679_v21, %v2678_v22 }
 0x888   :  { %v2682_v57 = vpop.permute.xlu0 %2681  ;;  %2253 = vmatprep.mubr.f32.mxu1 %v2178_v23 }
 0x889   :  { %v2684_v37 = vunpack.i.h.bf16 %v2682_v57  ;;  %v2683_v12 = vunpack.i.l.bf16 %v2682_v57  ;;  %2254 = vmatmul.mubr.f32.vlgmr.msra.gmra.mrb[20].mxu1 %v2177_v24 }
 0x88a   :  { %2612 = vmatpush1.bf16.msra.mxu1 %v3577_v53 }
 0x88b   :  { %v2180_v4 = vsel %vm2176_vm1, %v2683_v12, %v2175_v25  ;;  %v2179_v26 = vsel %vm2176_vm1, %v2684_v37, %v2683_v12  ;;  %2611 = vmatprep.subr.bf16.mxu1 %v3579_v55 }
 0x88c   :  { %2259 = vmatprep.mubr.f32.mxu1 %v2180_v4 }
 0x88d   :  { %2260 = vmatmul.mubr.f32.gmra.mrb[22].mxu1 %v2179_v26 }
 0x88e   :  { %2613 = vmatpush1.bf16.msra.mxu1 %v2536_v60  ;;  %2336 = vmatprep.mubr.f32.mxu1 %v2949_v0 }
 0x895   :  { %2465 = vmatmul.mubr.msk.f32.vlgmr.msra.gmra.mrb[22].mxu1 %vm1009_vm13, %v2175_v25 }
 0x8e2   :  { %v2073_v27 = vpop.f32.mrb[16].mxu0 }
 0x8e3   :  { %2084 = vst [vmem:[#allocation10] sm:$0xff] %v2073_v27  ;;  %v2075_v29 = vpop.f32.mrb[17].mxu0 }
 0x8e4   :  { %2085 = vst [vmem:[#allocation10 + $0x8] sm:$0xff] %v2075_v29 }
 0x8e6   :  { %v2079_v28 = vpop.f32.mrb[18].mxu0 }
 0x8e7   :  { %2086 = vst [vmem:[#allocation10 + $0x10] sm:$0xff] %v2079_v28  ;;  %v2081_v30 = vpop.f32.mrb[19].mxu0 }
 0x8e8   :  { %2087 = vst [vmem:[#allocation10 + $0x18] sm:$0xff] %v2081_v30 }
 0x953   :  { %v2332_v31 = vpop.f32.mrb[20].mxu0 }
 0x954   :  { %v2334_v32 = vpop.f32.mrb[21].mxu0 }
 0x95c   :  { %v2255_v33 = vpop.f32.mrb[20].mxu1 }
 0x95d   :  { %v2333_v39 = vadd.f32 %v2332_v31, %v2255_v33  ;;  %v2257_v34 = vpop.f32.mrb[21].mxu1 }
 0x95e   :  { %v2335_v35 = vadd.f32 %v2334_v32, %v2257_v34 }
 0x95f   :  { %2344 = vst [vmem:[#allocation10 + $0x20] sm:$0xff] %v2333_v39 }
 0x960   :  { %2345 = vst [vmem:[#allocation10 + $0x28] sm:$0xff] %v2335_v35 }
 0x968   :  { %v2338_v38 = vpop.f32.mrb[22].mxu1 }
 0x969   :  { %2346 = vst [vmem:[#allocation10 + $0x30] sm:$0xff] %v2338_v38  ;;  %v2340_v36 = vpop.f32.mrb[23].mxu1 }
 0x96a   :  { %2347 = vst [vmem:[#allocation10 + $0x38] sm:$0xff] %v2340_v36 }
 0x96b   :  { %2898 = shalt.err (!%p2895_p8)
}
 0x96c   :  { %s3636_s13 = sld [smem:[#allocation18_spill]] }
 0x972   :  { %s2899_s9 = scalar_lea.hbm %s3636_s13, 1024 }
 0x973   :  { %p2900_p9 = scmp.ne.s32.totalorder %s3636_s13, %s2899_s9  ;;  %p2903_p10 = scmp.lt.u32.totalorder %s2899_s9, %s3636_s13 }
 0x975   :  { %p2905_p11 = pnand %p2903_p10, %p2900_p9 }
 0x977   :  { %2908 = shalt.err (!%p2905_p11)
}
 0x978   :  { %2359 = dma.vmem_to_hbm [thread:$0]  %s2354_s24, 1024, %s3636_s13, [#allocation4], %s2925_s11, %s2925_s11, %s2926_s27  }
 0x979   :  { %2915 = dma.done.wait [#allocation4], 1024  }
 0x97a   :  { %2916 = vsyncadd [#allocation4], 4294966272 }
 0x97b   :  { %2363 = vsyncpa [#allocation3], 1 }
 0x97c   :  { %2364 = vsyncpa [#allocation6], 1 }
 0x97d   :  { %2365 = vsyncpa [#allocation9], 1 }
 0x97e   :  { %2366 = vsyncpa [#allocation4], 1 }

</bundles_post_ra>
